<compile_context>
chip_gen: v7x
topology: tpu7x:2x2x1
jax: 0.10.0
libtpu: 0.0.40
codegen_flags: <defaults>
</compile_context>

<pallas_src>
import numpy as np
import jax
import jax.numpy as jnp
from jax.experimental import pallas as pl
from jax.experimental.pallas import tpu as pltpu


def _make_kernel(tn, H, KH):
    """Fused conv(as matmul, in-kernel im2col) -> ReLU -> avg-pool -> FC kernel."""

    def kernel(x_ref, v_ref, bc_ref, p_ref, m_ref, bfc_ref, out_ref, h_buf):
        # x_ref  : [tn, H+KH-1, (W+KW-1)*Cin] f32  zero-padded input rows for tn images
        # v_ref  : [KH, (W+KW-1)*Cin, W*Cout] bf16 conv weights, dw taps folded in (block struct)
        # bc_ref : [1, W*Cout]  f32  conv bias tiled across w
        # p_ref  : [tn, tn*H]   f32  0/1 pooling matrix (sum over h per image, on the MXU)
        # m_ref  : [W*Cout, CP] f32  fc weights tiled across w, pre-divided by H*W, lane-padded
        # bfc_ref: [1, CP]      f32  fc bias, lane-padded
        # out_ref: [tn, CP]     f32  lane-dense logits (first `classes` lanes are real)
        # h_buf  : VMEM scratch [tn*H, W*Cout] f32
        x = x_ref[...]
        bc = bc_ref[...]
        vs = [v_ref[d] for d in range(KH)]          # hoisted: loaded once per grid step

        # In-kernel im2col: the dh kernel rows are static shifted row-slices of the padded
        # input; the dw taps are already folded into the block-structured weights vs[dh].
        for n in range(tn):                          # static unroll over images in the tile
            acc = jnp.dot(x[n, 0:H, :].astype(jnp.bfloat16), vs[0],
                          preferred_element_type=jnp.float32)
            for dh in range(1, KH):
                acc = acc + jnp.dot(x[n, dh:dh + H, :].astype(jnp.bfloat16), vs[dh],
                                    preferred_element_type=jnp.float32)
            # bias + ReLU on a fully lane-dense [H, W*Cout] tile, stored to scratch.
            h_buf[n * H:(n + 1) * H, :] = jnp.maximum(acc + bc, 0.0)

        # Pool (sum over h) via MXU matmul; the w-sum, 1/(H*W) and the FC are folded into m_ref.
        pooled = jnp.dot(p_ref[...], h_buf[...], preferred_element_type=jnp.float32)
        out_ref[...] = (jnp.dot(pooled, m_ref[...], preferred_element_type=jnp.float32)
                        + bfc_ref[...])

    return kernel


def make_forward(params, H=16, W=16, tn=8, lane_pad=128):
    """Fold weights once (hoisted) and return a jitted forward(x_nchw) -> [N, classes]."""
    conv_w = np.asarray(params["conv_w"], np.float32)    # [Cout, Cin, KH, KW]
    conv_b = np.asarray(params["conv_b"], np.float32)    # [Cout]
    fc_w = np.asarray(params["fc_w"], np.float32)        # [Cout, classes]
    fc_b = np.asarray(params["fc_b"], np.float32)        # [classes]
    cout, cin, kh, kw = conv_w.shape
    classes = fc_w.shape[1]

    Hp, Wp = H + kh - 1, W + kw - 1                      # zero-padded extents (SAME, stride 1)
    L = Wp * cin                                         # lanes of one padded input row  (= 72)
    WC = W * cout                                        # lanes of one conv-output row   (= 128)
    cpad = max(lane_pad, ((classes + lane_pad - 1) // lane_pad) * lane_pad)

    # ---- one-time weight folding (hoisted out of the forward path) ----
    # V[dh, wp*Cin + cin, w*Cout + cout] = conv_w[cout, cin, dh, wp - w]  (0 <= wp - w < KW)
    V = np.zeros((kh, L, WC), np.float32)
    for dh in range(kh):
        for w in range(W):
            for dw in range(kw):
                wp = w + dw
                V[dh, wp * cin:(wp + 1) * cin, w * cout:(w + 1) * cout] = conv_w[:, :, dh, dw].T
    bc = np.tile(conv_b, W).reshape(1, WC)                                   # [1, W*Cout]
    P = np.kron(np.eye(tn, dtype=np.float32), np.ones((1, H), np.float32))   # [tn, tn*H]
    M = np.zeros((WC, cpad), np.float32)
    M[:, :classes] = np.tile(fc_w, (W, 1)) / float(H * W)                    # fold 1/(H*W)
    bfc = np.zeros((1, cpad), np.float32)
    bfc[0, :classes] = fc_b

    V_d = jnp.asarray(V, jnp.bfloat16)                   # bf16 MXU operand
    bc_d = jnp.asarray(bc)
    P_d = jnp.asarray(P)
    M_d = jnp.asarray(M)
    bfc_d = jnp.asarray(bfc)

    kernel = _make_kernel(tn, H, kh)

    @jax.jit
    def forward(x_nchw):
        n = x_nchw.shape[0]
        n_pad = ((n + tn - 1) // tn) * tn
        # Layout glue (fused by jit): NCHW -> padded NHWC -> [Npad, H+2, (W+2)*Cin] rows.
        x = jnp.transpose(x_nchw.astype(jnp.float32), (0, 2, 3, 1))
        x = jnp.pad(x, ((0, n_pad - n), (kh // 2, kh // 2), (kw // 2, kw // 2), (0, 0)))
        x = x.reshape(n_pad, Hp, L)

        out = pl.pallas_call(
            kernel,
            out_shape=jax.ShapeDtypeStruct((n_pad, cpad), jnp.float32),
            grid=(n_pad // tn,),
            in_specs=[
                pl.BlockSpec((tn, Hp, L), lambda i: (i, 0, 0)),    # per-step image tile
                pl.BlockSpec((kh, L, WC), lambda i: (0, 0, 0)),    # resident folded conv weights
                pl.BlockSpec((1, WC), lambda i: (0, 0)),           # resident conv bias
                pl.BlockSpec((tn, tn * H), lambda i: (0, 0)),      # resident pooling matrix
                pl.BlockSpec((WC, cpad), lambda i: (0, 0)),        # resident pool+FC weights
                pl.BlockSpec((1, cpad), lambda i: (0, 0)),         # resident FC bias
            ],
            out_specs=pl.BlockSpec((tn, cpad), lambda i: (i, 0)),  # lane-dense output block
            scratch_shapes=[pltpu.VMEM((tn * H, WC), jnp.float32)],
            compiler_params=pltpu.CompilerParams(
                dimension_semantics=("parallel",)),                # megacore-shardable on v7x
        )(x, V_d, bc_d, P_d, M_d, bfc_d)
        return out[:n, :classes]

    return forward


def _reference_forward(x_nchw, params):
    """Pure-JAX reference of the same synthetic model, for verification."""
    conv_w, conv_b, fc_w, fc_b = (params["conv_w"], params["conv_b"],
                                  params["fc_w"], params["fc_b"])
    y = jax.lax.conv_general_dilated(
        x_nchw.astype(jnp.float32), conv_w.astype(jnp.float32),
        window_strides=(1, 1), padding="SAME",
        dimension_numbers=("NCHW", "OIHW", "NCHW"))
    y = y + conv_b.reshape(1, -1, 1, 1)
    y = jnp.maximum(y, 0.0)
    pooled = jnp.mean(y, axis=(2, 3))                            # [N, Cout]
    return pooled @ fc_w + fc_b.reshape(1, -1)


def init_params(key, cin=4, cout=8, kh=3, kw=3, classes=10):
    k1, k2, k3, k4 = jax.random.split(key, 4)
    return {
        "conv_w": 0.1 * jax.random.normal(k1, (cout, cin, kh, kw), jnp.float32),
        "conv_b": 0.1 * jax.random.normal(k2, (cout,), jnp.float32),
        "fc_w":   0.1 * jax.random.normal(k3, (cout, classes), jnp.float32),
        "fc_b":   0.1 * jax.random.normal(k4, (classes,), jnp.float32),
    }


if __name__ == "__main__":
    key = jax.random.PRNGKey(0)
    kx, kp = jax.random.split(key)

    N, CIN, H, W = 16, 4, 16, 16                # N=16 / tn=8 exercises the batch grid (2 steps)
    x = jax.random.normal(kx, (N, CIN, H, W), jnp.float32)       # NCHW like PyTorch
    params = init_params(kp, cin=CIN)

    fwd = make_forward(params, H=H, W=W, tn=8)
    out = jax.block_until_ready(fwd(x))

    ref = _reference_forward(x, params)
    assert out.shape == (N, 10)
    # bf16 MXU operands for the conv -> tolerance relaxed vs. the old pure-f32 check.
    assert jnp.allclose(out, ref, atol=1e-2, rtol=1e-2), (out, ref)

    print("KERNEL_OK")
</pallas_src>

<mosaic_0001>
module attributes {stable_mosaic.version = 11 : i64} {
  func.func @kernel(%arg0: i32, %arg1: memref<8x18x72xf32, #tpu.memory_space<vmem>>, %arg2: memref<3x72x128xbf16, #tpu.memory_space<vmem>>, %arg3: memref<1x128xf32, #tpu.memory_space<vmem>>, %arg4: memref<8x128xf32, #tpu.memory_space<vmem>>, %arg5: memref<128x128xf32, #tpu.memory_space<vmem>>, %arg6: memref<1x128xf32, #tpu.memory_space<vmem>>, %arg7: memref<8x128xf32, #tpu.memory_space<vmem>>, %arg8: memref<128x128xf32, #tpu.memory_space<vmem>>) attributes {dimension_semantics = [#tpu.dimension_semantics<parallel>], iteration_bounds = array<i64: 2>, scalar_prefetch = 0 : i64, scratch_operands = 1 : i64, tpu.core_type = #tpu.core_type<tc>, window_params = [{transform_indices = @transform_0, window_bounds = array<i64: 8, 18, 72>}, {pipeline_mode = #tpu.pipeline_mode<synchronous>, transform_indices = @transform_1, window_bounds = array<i64: 3, 72, 128>}, {pipeline_mode = #tpu.pipeline_mode<synchronous>, transform_indices = @transform_2, window_bounds = array<i64: 1, 128>}, {pipeline_mode = #tpu.pipeline_mode<synchronous>, transform_indices = @transform_3, window_bounds = array<i64: 8, 128>}, {pipeline_mode = #tpu.pipeline_mode<synchronous>, transform_indices = @transform_4, window_bounds = array<i64: 128, 128>}, {pipeline_mode = #tpu.pipeline_mode<synchronous>, transform_indices = @transform_5, window_bounds = array<i64: 1, 128>}, {transform_indices = @transform_6, window_bounds = array<i64: 8, 128>}]} {
    %c0 = arith.constant 0 : index
    %c0_0 = arith.constant 0 : index
    %c0_1 = arith.constant 0 : index
    %0 = vector.load %arg1[%c0, %c0_0, %c0_1] : memref<8x18x72xf32, #tpu.memory_space<vmem>>, vector<8x18x72xf32>
    %c0_2 = arith.constant 0 : index
    %c0_3 = arith.constant 0 : index
    %1 = vector.load %arg3[%c0_2, %c0_3] : memref<1x128xf32, #tpu.memory_space<vmem>>, vector<1x128xf32>
    %c0_4 = arith.constant 0 : index
    %c0_5 = arith.constant 0 : index
    %c0_6 = arith.constant 0 : index
    %2 = vector.load %arg2[%c0_4, %c0_5, %c0_6] : memref<3x72x128xbf16, #tpu.memory_space<vmem>>, vector<1x72x128xbf16>
    %3 = vector.shape_cast %2 : vector<1x72x128xbf16> to vector<72x128xbf16>
    %c1 = arith.constant 1 : index
    %c0_7 = arith.constant 0 : index
    %c0_8 = arith.constant 0 : index
    %4 = vector.load %arg2[%c1, %c0_7, %c0_8] : memref<3x72x128xbf16, #tpu.memory_space<vmem>>, vector<1x72x128xbf16>
    %5 = vector.shape_cast %4 : vector<1x72x128xbf16> to vector<72x128xbf16>
    %c2 = arith.constant 2 : index
    %c0_9 = arith.constant 0 : index
    %c0_10 = arith.constant 0 : index
    %6 = vector.load %arg2[%c2, %c0_9, %c0_10] : memref<3x72x128xbf16, #tpu.memory_space<vmem>>, vector<1x72x128xbf16>
    %7 = vector.shape_cast %6 : vector<1x72x128xbf16> to vector<72x128xbf16>
    %8 = vector.extract_strided_slice %0 {offsets = [0, 0, 0], sizes = [1, 16, 72], strides = [1, 1, 1]} : vector<8x18x72xf32> to vector<1x16x72xf32>
    %9 = vector.shape_cast %8 : vector<1x16x72xf32> to vector<16x72xf32>
    %10 = arith.truncf %9 : vector<16x72xf32> to vector<16x72xbf16>
    %cst = arith.constant dense<0.000000e+00> : vector<16x128xf32>
    %11 = tpu.matmul %10, %3, %cst {dimension_numbers = #tpu.dot_dimension_numbers<[1], [0], [0], [1], [0, 0, 1, 1], [], []>} : vector<16x72xbf16>, vector<72x128xbf16>, vector<16x128xf32> -> vector<16x128xf32>
    %12 = vector.extract_strided_slice %0 {offsets = [0, 1, 0], sizes = [1, 16, 72], strides = [1, 1, 1]} : vector<8x18x72xf32> to vector<1x16x72xf32>
    %13 = vector.shape_cast %12 : vector<1x16x72xf32> to vector<16x72xf32>
    %14 = arith.truncf %13 : vector<16x72xf32> to vector<16x72xbf16>
    %cst_11 = arith.constant dense<0.000000e+00> : vector<16x128xf32>
    %15 = tpu.matmul %14, %5, %cst_11 {dimension_numbers = #tpu.dot_dimension_numbers<[1], [0], [0], [1], [0, 0, 1, 1], [], []>} : vector<16x72xbf16>, vector<72x128xbf16>, vector<16x128xf32> -> vector<16x128xf32>
    %16 = arith.addf %11, %15 : vector<16x128xf32>
    %17 = vector.extract_strided_slice %0 {offsets = [0, 2, 0], sizes = [1, 16, 72], strides = [1, 1, 1]} : vector<8x18x72xf32> to vector<1x16x72xf32>
    %18 = vector.shape_cast %17 : vector<1x16x72xf32> to vector<16x72xf32>
    %19 = arith.truncf %18 : vector<16x72xf32> to vector<16x72xbf16>
    %cst_12 = arith.constant dense<0.000000e+00> : vector<16x128xf32>
    %20 = tpu.matmul %19, %7, %cst_12 {dimension_numbers = #tpu.dot_dimension_numbers<[1], [0], [0], [1], [0, 0, 1, 1], [], []>} : vector<16x72xbf16>, vector<72x128xbf16>, vector<16x128xf32> -> vector<16x128xf32>
    %21 = arith.addf %16, %20 : vector<16x128xf32>
    %22 = vector.broadcast %1 : vector<1x128xf32> to vector<16x128xf32>
    %23 = arith.addf %21, %22 : vector<16x128xf32>
    %cst_13 = arith.constant 0.000000e+00 : f32
    %24 = vector.broadcast %cst_13 : f32 to vector<16x128xf32>
    %25 = arith.maximumf %23, %24 : vector<16x128xf32>
    %c0_14 = arith.constant 0 : index
    %c0_15 = arith.constant 0 : index
    %26 = vector.load %arg8[%c0_14, %c0_15] : memref<128x128xf32, #tpu.memory_space<vmem>>, vector<16x128xf32>
    tpu.vector_store %arg8[%c0_14, %c0_15], %25 {strides = array<i32>} : memref<128x128xf32, #tpu.memory_space<vmem>>, vector<16x128xf32>,
    %27 = vector.extract_strided_slice %0 {offsets = [1, 0, 0], sizes = [1, 16, 72], strides = [1, 1, 1]} : vector<8x18x72xf32> to vector<1x16x72xf32>
    %28 = vector.shape_cast %27 : vector<1x16x72xf32> to vector<16x72xf32>
    %29 = arith.truncf %28 : vector<16x72xf32> to vector<16x72xbf16>
    %cst_16 = arith.constant dense<0.000000e+00> : vector<16x128xf32>
    %30 = tpu.matmul %29, %3, %cst_16 {dimension_numbers = #tpu.dot_dimension_numbers<[1], [0], [0], [1], [0, 0, 1, 1], [], []>} : vector<16x72xbf16>, vector<72x128xbf16>, vector<16x128xf32> -> vector<16x128xf32>
    %31 = vector.extract_strided_slice %0 {offsets = [1, 1, 0], sizes = [1, 16, 72], strides = [1, 1, 1]} : vector<8x18x72xf32> to vector<1x16x72xf32>
    %32 = vector.shape_cast %31 : vector<1x16x72xf32> to vector<16x72xf32>
    %33 = arith.truncf %32 : vector<16x72xf32> to vector<16x72xbf16>
    %cst_17 = arith.constant dense<0.000000e+00> : vector<16x128xf32>
    %34 = tpu.matmul %33, %5, %cst_17 {dimension_numbers = #tpu.dot_dimension_numbers<[1], [0], [0], [1], [0, 0, 1, 1], [], []>} : vector<16x72xbf16>, vector<72x128xbf16>, vector<16x128xf32> -> vector<16x128xf32>
    %35 = arith.addf %30, %34 : vector<16x128xf32>
    %36 = vector.extract_strided_slice %0 {offsets = [1, 2, 0], sizes = [1, 16, 72], strides = [1, 1, 1]} : vector<8x18x72xf32> to vector<1x16x72xf32>
    %37 = vector.shape_cast %36 : vector<1x16x72xf32> to vector<16x72xf32>
    %38 = arith.truncf %37 : vector<16x72xf32> to vector<16x72xbf16>
    %cst_18 = arith.constant dense<0.000000e+00> : vector<16x128xf32>
    %39 = tpu.matmul %38, %7, %cst_18 {dimension_numbers = #tpu.dot_dimension_numbers<[1], [0], [0], [1], [0, 0, 1, 1], [], []>} : vector<16x72xbf16>, vector<72x128xbf16>, vector<16x128xf32> -> vector<16x128xf32>
    %40 = arith.addf %35, %39 : vector<16x128xf32>
    %41 = vector.broadcast %1 : vector<1x128xf32> to vector<16x128xf32>
    %42 = arith.addf %40, %41 : vector<16x128xf32>
    %cst_19 = arith.constant 0.000000e+00 : f32
    %43 = vector.broadcast %cst_19 : f32 to vector<16x128xf32>
    %44 = arith.maximumf %42, %43 : vector<16x128xf32>
    %c16 = arith.constant 16 : index
    %c0_20 = arith.constant 0 : index
    %45 = vector.load %arg8[%c16, %c0_20] : memref<128x128xf32, #tpu.memory_space<vmem>>, vector<16x128xf32>
    tpu.vector_store %arg8[%c16, %c0_20], %44 {strides = array<i32>} : memref<128x128xf32, #tpu.memory_space<vmem>>, vector<16x128xf32>,
    %46 = vector.extract_strided_slice %0 {offsets = [2, 0, 0], sizes = [1, 16, 72], strides = [1, 1, 1]} : vector<8x18x72xf32> to vector<1x16x72xf32>
    %47 = vector.shape_cast %46 : vector<1x16x72xf32> to vector<16x72xf32>
    %48 = arith.truncf %47 : vector<16x72xf32> to vector<16x72xbf16>
    %cst_21 = arith.constant dense<0.000000e+00> : vector<16x128xf32>
    %49 = tpu.matmul %48, %3, %cst_21 {dimension_numbers = #tpu.dot_dimension_numbers<[1], [0], [0], [1], [0, 0, 1, 1], [], []>} : vector<16x72xbf16>, vector<72x128xbf16>, vector<16x128xf32> -> vector<16x128xf32>
    %50 = vector.extract_strided_slice %0 {offsets = [2, 1, 0], sizes = [1, 16, 72], strides = [1, 1, 1]} : vector<8x18x72xf32> to vector<1x16x72xf32>
    %51 = vector.shape_cast %50 : vector<1x16x72xf32> to vector<16x72xf32>
    %52 = arith.truncf %51 : vector<16x72xf32> to vector<16x72xbf16>
    %cst_22 = arith.constant dense<0.000000e+00> : vector<16x128xf32>
    %53 = tpu.matmul %52, %5, %cst_22 {dimension_numbers = #tpu.dot_dimension_numbers<[1], [0], [0], [1], [0, 0, 1, 1], [], []>} : vector<16x72xbf16>, vector<72x128xbf16>, vector<16x128xf32> -> vector<16x128xf32>
    %54 = arith.addf %49, %53 : vector<16x128xf32>
    %55 = vector.extract_strided_slice %0 {offsets = [2, 2, 0], sizes = [1, 16, 72], strides = [1, 1, 1]} : vector<8x18x72xf32> to vector<1x16x72xf32>
    %56 = vector.shape_cast %55 : vector<1x16x72xf32> to vector<16x72xf32>
    %57 = arith.truncf %56 : vector<16x72xf32> to vector<16x72xbf16>
    %cst_23 = arith.constant dense<0.000000e+00> : vector<16x128xf32>
    %58 = tpu.matmul %57, %7, %cst_23 {dimension_numbers = #tpu.dot_dimension_numbers<[1], [0], [0], [1], [0, 0, 1, 1], [], []>} : vector<16x72xbf16>, vector<72x128xbf16>, vector<16x128xf32> -> vector<16x128xf32>
    %59 = arith.addf %54, %58 : vector<16x128xf32>
    %60 = vector.broadcast %1 : vector<1x128xf32> to vector<16x128xf32>
    %61 = arith.addf %59, %60 : vector<16x128xf32>
    %cst_24 = arith.constant 0.000000e+00 : f32
    %62 = vector.broadcast %cst_24 : f32 to vector<16x128xf32>
    %63 = arith.maximumf %61, %62 : vector<16x128xf32>
    %c32 = arith.constant 32 : index
    %c0_25 = arith.constant 0 : index
    %64 = vector.load %arg8[%c32, %c0_25] : memref<128x128xf32, #tpu.memory_space<vmem>>, vector<16x128xf32>
    tpu.vector_store %arg8[%c32, %c0_25], %63 {strides = array<i32>} : memref<128x128xf32, #tpu.memory_space<vmem>>, vector<16x128xf32>,
    %65 = vector.extract_strided_slice %0 {offsets = [3, 0, 0], sizes = [1, 16, 72], strides = [1, 1, 1]} : vector<8x18x72xf32> to vector<1x16x72xf32>
    %66 = vector.shape_cast %65 : vector<1x16x72xf32> to vector<16x72xf32>
    %67 = arith.truncf %66 : vector<16x72xf32> to vector<16x72xbf16>
    %cst_26 = arith.constant dense<0.000000e+00> : vector<16x128xf32>
    %68 = tpu.matmul %67, %3, %cst_26 {dimension_numbers = #tpu.dot_dimension_numbers<[1], [0], [0], [1], [0, 0, 1, 1], [], []>} : vector<16x72xbf16>, vector<72x128xbf16>, vector<16x128xf32> -> vector<16x128xf32>
    %69 = vector.extract_strided_slice %0 {offsets = [3, 1, 0], sizes = [1, 16, 72], strides = [1, 1, 1]} : vector<8x18x72xf32> to vector<1x16x72xf32>
    %70 = vector.shape_cast %69 : vector<1x16x72xf32> to vector<16x72xf32>
    %71 = arith.truncf %70 : vector<16x72xf32> to vector<16x72xbf16>
    %cst_27 = arith.constant dense<0.000000e+00> : vector<16x128xf32>
    %72 = tpu.matmul %71, %5, %cst_27 {dimension_numbers = #tpu.dot_dimension_numbers<[1], [0], [0], [1], [0, 0, 1, 1], [], []>} : vector<16x72xbf16>, vector<72x128xbf16>, vector<16x128xf32> -> vector<16x128xf32>
    %73 = arith.addf %68, %72 : vector<16x128xf32>
    %74 = vector.extract_strided_slice %0 {offsets = [3, 2, 0], sizes = [1, 16, 72], strides = [1, 1, 1]} : vector<8x18x72xf32> to vector<1x16x72xf32>
    %75 = vector.shape_cast %74 : vector<1x16x72xf32> to vector<16x72xf32>
    %76 = arith.truncf %75 : vector<16x72xf32> to vector<16x72xbf16>
    %cst_28 = arith.constant dense<0.000000e+00> : vector<16x128xf32>
    %77 = tpu.matmul %76, %7, %cst_28 {dimension_numbers = #tpu.dot_dimension_numbers<[1], [0], [0], [1], [0, 0, 1, 1], [], []>} : vector<16x72xbf16>, vector<72x128xbf16>, vector<16x128xf32> -> vector<16x128xf32>
    %78 = arith.addf %73, %77 : vector<16x128xf32>
    %79 = vector.broadcast %1 : vector<1x128xf32> to vector<16x128xf32>
    %80 = arith.addf %78, %79 : vector<16x128xf32>
    %cst_29 = arith.constant 0.000000e+00 : f32
    %81 = vector.broadcast %cst_29 : f32 to vector<16x128xf32>
    %82 = arith.maximumf %80, %81 : vector<16x128xf32>
    %c48 = arith.constant 48 : index
    %c0_30 = arith.constant 0 : index
    %83 = vector.load %arg8[%c48, %c0_30] : memref<128x128xf32, #tpu.memory_space<vmem>>, vector<16x128xf32>
    tpu.vector_store %arg8[%c48, %c0_30], %82 {strides = array<i32>} : memref<128x128xf32, #tpu.memory_space<vmem>>, vector<16x128xf32>,
    %84 = vector.extract_strided_slice %0 {offsets = [4, 0, 0], sizes = [1, 16, 72], strides = [1, 1, 1]} : vector<8x18x72xf32> to vector<1x16x72xf32>
    %85 = vector.shape_cast %84 : vector<1x16x72xf32> to vector<16x72xf32>
    %86 = arith.truncf %85 : vector<16x72xf32> to vector<16x72xbf16>
    %cst_31 = arith.constant dense<0.000000e+00> : vector<16x128xf32>
    %87 = tpu.matmul %86, %3, %cst_31 {dimension_numbers = #tpu.dot_dimension_numbers<[1], [0], [0], [1], [0, 0, 1, 1], [], []>} : vector<16x72xbf16>, vector<72x128xbf16>, vector<16x128xf32> -> vector<16x128xf32>
    %88 = vector.extract_strided_slice %0 {offsets = [4, 1, 0], sizes = [1, 16, 72], strides = [1, 1, 1]} : vector<8x18x72xf32> to vector<1x16x72xf32>
    %89 = vector.shape_cast %88 : vector<1x16x72xf32> to vector<16x72xf32>
    %90 = arith.truncf %89 : vector<16x72xf32> to vector<16x72xbf16>
    %cst_32 = arith.constant dense<0.000000e+00> : vector<16x128xf32>
    %91 = tpu.matmul %90, %5, %cst_32 {dimension_numbers = #tpu.dot_dimension_numbers<[1], [0], [0], [1], [0, 0, 1, 1], [], []>} : vector<16x72xbf16>, vector<72x128xbf16>, vector<16x128xf32> -> vector<16x128xf32>
    %92 = arith.addf %87, %91 : vector<16x128xf32>
    %93 = vector.extract_strided_slice %0 {offsets = [4, 2, 0], sizes = [1, 16, 72], strides = [1, 1, 1]} : vector<8x18x72xf32> to vector<1x16x72xf32>
    %94 = vector.shape_cast %93 : vector<1x16x72xf32> to vector<16x72xf32>
    %95 = arith.truncf %94 : vector<16x72xf32> to vector<16x72xbf16>
    %cst_33 = arith.constant dense<0.000000e+00> : vector<16x128xf32>
    %96 = tpu.matmul %95, %7, %cst_33 {dimension_numbers = #tpu.dot_dimension_numbers<[1], [0], [0], [1], [0, 0, 1, 1], [], []>} : vector<16x72xbf16>, vector<72x128xbf16>, vector<16x128xf32> -> vector<16x128xf32>
    %97 = arith.addf %92, %96 : vector<16x128xf32>
    %98 = vector.broadcast %1 : vector<1x128xf32> to vector<16x128xf32>
    %99 = arith.addf %97, %98 : vector<16x128xf32>
    %cst_34 = arith.constant 0.000000e+00 : f32
    %100 = vector.broadcast %cst_34 : f32 to vector<16x128xf32>
    %101 = arith.maximumf %99, %100 : vector<16x128xf32>
    %c64 = arith.constant 64 : index
    %c0_35 = arith.constant 0 : index
    %102 = vector.load %arg8[%c64, %c0_35] : memref<128x128xf32, #tpu.memory_space<vmem>>, vector<16x128xf32>
    tpu.vector_store %arg8[%c64, %c0_35], %101 {strides = array<i32>} : memref<128x128xf32, #tpu.memory_space<vmem>>, vector<16x128xf32>,
    %103 = vector.extract_strided_slice %0 {offsets = [5, 0, 0], sizes = [1, 16, 72], strides = [1, 1, 1]} : vector<8x18x72xf32> to vector<1x16x72xf32>
    %104 = vector.shape_cast %103 : vector<1x16x72xf32> to vector<16x72xf32>
    %105 = arith.truncf %104 : vector<16x72xf32> to vector<16x72xbf16>
    %cst_36 = arith.constant dense<0.000000e+00> : vector<16x128xf32>
    %106 = tpu.matmul %105, %3, %cst_36 {dimension_numbers = #tpu.dot_dimension_numbers<[1], [0], [0], [1], [0, 0, 1, 1], [], []>} : vector<16x72xbf16>, vector<72x128xbf16>, vector<16x128xf32> -> vector<16x128xf32>
    %107 = vector.extract_strided_slice %0 {offsets = [5, 1, 0], sizes = [1, 16, 72], strides = [1, 1, 1]} : vector<8x18x72xf32> to vector<1x16x72xf32>
    %108 = vector.shape_cast %107 : vector<1x16x72xf32> to vector<16x72xf32>
    %109 = arith.truncf %108 : vector<16x72xf32> to vector<16x72xbf16>
    %cst_37 = arith.constant dense<0.000000e+00> : vector<16x128xf32>
    %110 = tpu.matmul %109, %5, %cst_37 {dimension_numbers = #tpu.dot_dimension_numbers<[1], [0], [0], [1], [0, 0, 1, 1], [], []>} : vector<16x72xbf16>, vector<72x128xbf16>, vector<16x128xf32> -> vector<16x128xf32>
    %111 = arith.addf %106, %110 : vector<16x128xf32>
    %112 = vector.extract_strided_slice %0 {offsets = [5, 2, 0], sizes = [1, 16, 72], strides = [1, 1, 1]} : vector<8x18x72xf32> to vector<1x16x72xf32>
    %113 = vector.shape_cast %112 : vector<1x16x72xf32> to vector<16x72xf32>
    %114 = arith.truncf %113 : vector<16x72xf32> to vector<16x72xbf16>
    %cst_38 = arith.constant dense<0.000000e+00> : vector<16x128xf32>
    %115 = tpu.matmul %114, %7, %cst_38 {dimension_numbers = #tpu.dot_dimension_numbers<[1], [0], [0], [1], [0, 0, 1, 1], [], []>} : vector<16x72xbf16>, vector<72x128xbf16>, vector<16x128xf32> -> vector<16x128xf32>
    %116 = arith.addf %111, %115 : vector<16x128xf32>
    %117 = vector.broadcast %1 : vector<1x128xf32> to vector<16x128xf32>
    %118 = arith.addf %116, %117 : vector<16x128xf32>
    %cst_39 = arith.constant 0.000000e+00 : f32
    %119 = vector.broadcast %cst_39 : f32 to vector<16x128xf32>
    %120 = arith.maximumf %118, %119 : vector<16x128xf32>
    %c80 = arith.constant 80 : index
    %c0_40 = arith.constant 0 : index
    %121 = vector.load %arg8[%c80, %c0_40] : memref<128x128xf32, #tpu.memory_space<vmem>>, vector<16x128xf32>
    tpu.vector_store %arg8[%c80, %c0_40], %120 {strides = array<i32>} : memref<128x128xf32, #tpu.memory_space<vmem>>, vector<16x128xf32>,
    %122 = vector.extract_strided_slice %0 {offsets = [6, 0, 0], sizes = [1, 16, 72], strides = [1, 1, 1]} : vector<8x18x72xf32> to vector<1x16x72xf32>
    %123 = vector.shape_cast %122 : vector<1x16x72xf32> to vector<16x72xf32>
    %124 = arith.truncf %123 : vector<16x72xf32> to vector<16x72xbf16>
    %cst_41 = arith.constant dense<0.000000e+00> : vector<16x128xf32>
    %125 = tpu.matmul %124, %3, %cst_41 {dimension_numbers = #tpu.dot_dimension_numbers<[1], [0], [0], [1], [0, 0, 1, 1], [], []>} : vector<16x72xbf16>, vector<72x128xbf16>, vector<16x128xf32> -> vector<16x128xf32>
    %126 = vector.extract_strided_slice %0 {offsets = [6, 1, 0], sizes = [1, 16, 72], strides = [1, 1, 1]} : vector<8x18x72xf32> to vector<1x16x72xf32>
    %127 = vector.shape_cast %126 : vector<1x16x72xf32> to vector<16x72xf32>
    %128 = arith.truncf %127 : vector<16x72xf32> to vector<16x72xbf16>
    %cst_42 = arith.constant dense<0.000000e+00> : vector<16x128xf32>
    %129 = tpu.matmul %128, %5, %cst_42 {dimension_numbers = #tpu.dot_dimension_numbers<[1], [0], [0], [1], [0, 0, 1, 1], [], []>} : vector<16x72xbf16>, vector<72x128xbf16>, vector<16x128xf32> -> vector<16x128xf32>
    %130 = arith.addf %125, %129 : vector<16x128xf32>
    %131 = vector.extract_strided_slice %0 {offsets = [6, 2, 0], sizes = [1, 16, 72], strides = [1, 1, 1]} : vector<8x18x72xf32> to vector<1x16x72xf32>
    %132 = vector.shape_cast %131 : vector<1x16x72xf32> to vector<16x72xf32>
    %133 = arith.truncf %132 : vector<16x72xf32> to vector<16x72xbf16>
    %cst_43 = arith.constant dense<0.000000e+00> : vector<16x128xf32>
    %134 = tpu.matmul %133, %7, %cst_43 {dimension_numbers = #tpu.dot_dimension_numbers<[1], [0], [0], [1], [0, 0, 1, 1], [], []>} : vector<16x72xbf16>, vector<72x128xbf16>, vector<16x128xf32> -> vector<16x128xf32>
    %135 = arith.addf %130, %134 : vector<16x128xf32>
    %136 = vector.broadcast %1 : vector<1x128xf32> to vector<16x128xf32>
    %137 = arith.addf %135, %136 : vector<16x128xf32>
    %cst_44 = arith.constant 0.000000e+00 : f32
    %138 = vector.broadcast %cst_44 : f32 to vector<16x128xf32>
    %139 = arith.maximumf %137, %138 : vector<16x128xf32>
    %c96 = arith.constant 96 : index
    %c0_45 = arith.constant 0 : index
    %140 = vector.load %arg8[%c96, %c0_45] : memref<128x128xf32, #tpu.memory_space<vmem>>, vector<16x128xf32>
    tpu.vector_store %arg8[%c96, %c0_45], %139 {strides = array<i32>} : memref<128x128xf32, #tpu.memory_space<vmem>>, vector<16x128xf32>,
    %141 = vector.extract_strided_slice %0 {offsets = [7, 0, 0], sizes = [1, 16, 72], strides = [1, 1, 1]} : vector<8x18x72xf32> to vector<1x16x72xf32>
    %142 = vector.shape_cast %141 : vector<1x16x72xf32> to vector<16x72xf32>
    %143 = arith.truncf %142 : vector<16x72xf32> to vector<16x72xbf16>
    %cst_46 = arith.constant dense<0.000000e+00> : vector<16x128xf32>
    %144 = tpu.matmul %143, %3, %cst_46 {dimension_numbers = #tpu.dot_dimension_numbers<[1], [0], [0], [1], [0, 0, 1, 1], [], []>} : vector<16x72xbf16>, vector<72x128xbf16>, vector<16x128xf32> -> vector<16x128xf32>
    %145 = vector.extract_strided_slice %0 {offsets = [7, 1, 0], sizes = [1, 16, 72], strides = [1, 1, 1]} : vector<8x18x72xf32> to vector<1x16x72xf32>
    %146 = vector.shape_cast %145 : vector<1x16x72xf32> to vector<16x72xf32>
    %147 = arith.truncf %146 : vector<16x72xf32> to vector<16x72xbf16>
    %cst_47 = arith.constant dense<0.000000e+00> : vector<16x128xf32>
    %148 = tpu.matmul %147, %5, %cst_47 {dimension_numbers = #tpu.dot_dimension_numbers<[1], [0], [0], [1], [0, 0, 1, 1], [], []>} : vector<16x72xbf16>, vector<72x128xbf16>, vector<16x128xf32> -> vector<16x128xf32>
    %149 = arith.addf %144, %148 : vector<16x128xf32>
    %150 = vector.extract_strided_slice %0 {offsets = [7, 2, 0], sizes = [1, 16, 72], strides = [1, 1, 1]} : vector<8x18x72xf32> to vector<1x16x72xf32>
    %151 = vector.shape_cast %150 : vector<1x16x72xf32> to vector<16x72xf32>
    %152 = arith.truncf %151 : vector<16x72xf32> to vector<16x72xbf16>
    %cst_48 = arith.constant dense<0.000000e+00> : vector<16x128xf32>
    %153 = tpu.matmul %152, %7, %cst_48 {dimension_numbers = #tpu.dot_dimension_numbers<[1], [0], [0], [1], [0, 0, 1, 1], [], []>} : vector<16x72xbf16>, vector<72x128xbf16>, vector<16x128xf32> -> vector<16x128xf32>
    %154 = arith.addf %149, %153 : vector<16x128xf32>
    %155 = vector.broadcast %1 : vector<1x128xf32> to vector<16x128xf32>
    %156 = arith.addf %154, %155 : vector<16x128xf32>
    %cst_49 = arith.constant 0.000000e+00 : f32
    %157 = vector.broadcast %cst_49 : f32 to vector<16x128xf32>
    %158 = arith.maximumf %156, %157 : vector<16x128xf32>
    %c112 = arith.constant 112 : index
    %c0_50 = arith.constant 0 : index
    %159 = vector.load %arg8[%c112, %c0_50] : memref<128x128xf32, #tpu.memory_space<vmem>>, vector<16x128xf32>
    tpu.vector_store %arg8[%c112, %c0_50], %158 {strides = array<i32>} : memref<128x128xf32, #tpu.memory_space<vmem>>, vector<16x128xf32>,
    %c0_51 = arith.constant 0 : index
    %c0_52 = arith.constant 0 : index
    %160 = vector.load %arg4[%c0_51, %c0_52] : memref<8x128xf32, #tpu.memory_space<vmem>>, vector<8x128xf32>
    %c0_53 = arith.constant 0 : index
    %c0_54 = arith.constant 0 : index
    %161 = vector.load %arg8[%c0_53, %c0_54] : memref<128x128xf32, #tpu.memory_space<vmem>>, vector<128x128xf32>
    %cst_55 = arith.constant dense<0.000000e+00> : vector<8x128xf32>
    %162 = tpu.matmul %160, %161, %cst_55 {dimension_numbers = #tpu.dot_dimension_numbers<[1], [0], [0], [1], [0, 0, 1, 1], [], []>} : vector<8x128xf32>, vector<128x128xf32>, vector<8x128xf32> -> vector<8x128xf32>
    %c0_56 = arith.constant 0 : index
    %c0_57 = arith.constant 0 : index
    %163 = vector.load %arg5[%c0_56, %c0_57] : memref<128x128xf32, #tpu.memory_space<vmem>>, vector<128x128xf32>
    %cst_58 = arith.constant dense<0.000000e+00> : vector<8x128xf32>
    %164 = tpu.matmul %162, %163, %cst_58 {dimension_numbers = #tpu.dot_dimension_numbers<[1], [0], [0], [1], [0, 0, 1, 1], [], []>} : vector<8x128xf32>, vector<128x128xf32>, vector<8x128xf32> -> vector<8x128xf32>
    %c0_59 = arith.constant 0 : index
    %c0_60 = arith.constant 0 : index
    %165 = vector.load %arg6[%c0_59, %c0_60] : memref<1x128xf32, #tpu.memory_space<vmem>>, vector<1x128xf32>
    %166 = vector.broadcast %165 : vector<1x128xf32> to vector<8x128xf32>
    %167 = arith.addf %164, %166 : vector<8x128xf32>
    %c0_61 = arith.constant 0 : index
    %c0_62 = arith.constant 0 : index
    %168 = vector.load %arg7[%c0_61, %c0_62] : memref<8x128xf32, #tpu.memory_space<vmem>>, vector<8x128xf32>
    tpu.vector_store %arg7[%c0_61, %c0_62], %167 {strides = array<i32>} : memref<8x128xf32, #tpu.memory_space<vmem>>, vector<8x128xf32>,
    return
  }
  func.func @transform_0(%arg0: i32) -> (i32, i32, i32) {
    %c0_i32 = arith.constant 0 : i32
    %c0_i32_0 = arith.constant 0 : i32
    %c0_i32_1 = arith.constant 0 : i32
    return %arg0, %c0_i32, %c0_i32_0 : i32, i32, i32
  }
  func.func @transform_1(%arg0: i32) -> (i32, i32, i32) {
    %c0_i32 = arith.constant 0 : i32
    %c0_i32_0 = arith.constant 0 : i32
    %c0_i32_1 = arith.constant 0 : i32
    %c0_i32_2 = arith.constant 0 : i32
    return %c0_i32, %c0_i32_0, %c0_i32_1 : i32, i32, i32
  }
  func.func @transform_2(%arg0: i32) -> (i32, i32) {
    %c0_i32 = arith.constant 0 : i32
    %c0_i32_0 = arith.constant 0 : i32
    %c0_i32_1 = arith.constant 0 : i32
    return %c0_i32, %c0_i32_0 : i32, i32
  }
  func.func @transform_3(%arg0: i32) -> (i32, i32) {
    %c0_i32 = arith.constant 0 : i32
    %c0_i32_0 = arith.constant 0 : i32
    %c0_i32_1 = arith.constant 0 : i32
    return %c0_i32, %c0_i32_0 : i32, i32
  }
  func.func @transform_4(%arg0: i32) -> (i32, i32) {
    %c0_i32 = arith.constant 0 : i32
    %c0_i32_0 = arith.constant 0 : i32
    %c0_i32_1 = arith.constant 0 : i32
    return %c0_i32, %c0_i32_0 : i32, i32
  }
  func.func @transform_5(%arg0: i32) -> (i32, i32) {
    %c0_i32 = arith.constant 0 : i32
    %c0_i32_0 = arith.constant 0 : i32
    %c0_i32_1 = arith.constant 0 : i32
    return %c0_i32, %c0_i32_0 : i32, i32
  }
  func.func @transform_6(%arg0: i32) -> (i32, i32) {
    %c0_i32 = arith.constant 0 : i32
    %c0_i32_0 = arith.constant 0 : i32
    return %arg0, %c0_i32 : i32, i32
  }
}

</mosaic_0001>

<bundles_post_ra>
// kernel: forward.1
= control target key start
LH: loop header
LB: loop body
LE: loop exit
PB: predicated region body
PF: predicated region fallthrough
CT: control target
= control target key end

     0   :  { %11 = vsyncpa [#allocation4], 0  ;;  %s3457_s0 = inlined_call_operand.vmem [shape: f32[16,18,72], index: 0, kind: input, shape index: {}]   ;;  %s3458_s1 = inlined_call_operand.vmem [shape: bf16[3,72,128], index: 1, kind: input, shape index: {}]   ;;  %s3459_s2 = inlined_call_operand.vmem [shape: f32[1,128], index: 2, kind: input, shape index: {}]   ;;  %s3460_s3 = inlined_call_operand.vmem [shape: f32[8,128], index: 3, kind: input, shape index: {}]   ;;  %s3461_s4 = inlined_call_operand.vmem [shape: f32[128,128], index: 4, kind: input, shape index: {}]   ;;  %s3462_s5 = inlined_call_operand.vmem [shape: f32[1,128], index: 5, kind: input, shape index: {}]   ;;  %s3463_s6 = inlined_call_operand.hbm [shape: f32[16,128], index: 6, kind: output, shape index: {}]  }
   0x1   :  { %13 = vsyncpa [#allocation4 + $0x1], 0  ;;  %s2791_s21 = smov 0   ;;  %s2793_s22 = smov 0  }
   0x2   :  { %s2795_s23 = smov 0   ;;  %s2797_s24 = smov 0  }
   0x3 LB: > { %s2812_s25 = sadd.s32 4294967295, %s2750_s24   ;;  %s1928_s26 = sadd.s32 4294967294, %s2750_s24   ;;  %s2750_s24 = sphi %s2797_s24, %s3469_s24   ;;  %s2746_s23 = sphi %s2795_s23, %s3468_s23   ;;  %s2742_s22 = sphi %s2793_s22, %s3467_s22   ;;  %s2738_s21 = sphi %s2791_s21, %s3466_s21  }
   0x4   : > { %s2816_s27 = sadd.s32 1, %s2750_s24   ;;  %s157_s28 = sadd.s32 1, %s2746_s23 }
   0x5   : > { %s154_s29 = ssub.s32 %s2750_s24, %s2816_s27  ;;  %p167_p0 = scmp.ne.s32.totalorder %s2746_s23, %s2742_s22 }
   0x6   : > { %p155_p1 = scmp.eq.s32.totalorder %s154_s29, 0  ;;  %p168_p2 = scmp.eq.s32.totalorder %s2812_s25, 1 }
   0x7   : > { %p173_p3 = scmp.ne.s32.totalorder %s2742_s22, %s2738_s21  ;;  %p174_p4 = scmp.eq.s32.totalorder %s1928_s26, 1 }
   0x8   : > { %s2827_s30 = scalar_select %p155_p1, %s2746_s23, %s157_s28  }
   0x9   : > { %p2829_p5 = por %p168_p2, %p167_p0  ;;  %p2833_p6 = por %p174_p4, %p173_p3 }
   0xa   : > { %p1931_p7 = scmp.ge.s32.totalorder %s2750_s24, 1  ;;  %p217_p8 = scmp.lt.s32.totalorder %s2750_s24, 3 }
   0xc   : > { %p218_p9 = pnand %p1931_p7, %p217_p8 }
   0xd   : > { %v2842_v0 = vld [vmem:[%s3458_s1 + $0x24] sm:$0xff] (!%p218_p9)   ;;  %v2752_v1 = vmov (!%p218_p9), 0.0   ;;  %v2855_v3 = vld [vmem:[%s3458_s1 + $0x2c] sm:$0xff] (!%p218_p9)   ;;  %s1933_s17 = sshll.u32 (!%p218_p9), %s2812_s25, 3  ;;  %vm2753_vm0 = vmmov (!%p218_p9), 0   ;;  %v2874_v5 = vld [vmem:[%s3458_s1 + $0x34] sm:$0xff] (!%p218_p9)  }
   0xe   : > { %221 = sbr.rel (%p218_p9) target bundleno = 922 (0x39a), region = 44  ;;  %2176 = vmatprep.subr.bf16.mxu0 (!%p218_p9), %v2752_v1  ;;  %2190 = vmatprep.subr.bf16.mxu1 (!%p218_p9), %v2752_v1  ;;  %v2849_v2 = vld [vmem:[%s3458_s1] sm:$0xff] (!%p218_p9)   ;;  %v2862_v4 = vld [vmem:[%s3458_s1 + $0x8] sm:$0xff] (!%p218_p9)   ;;  %p249_p10 = scmp.lt.s32.totalorder (!%p218_p9), %s1933_s17, 15  ;;  %v2881_v6 = vld [vmem:[%s3458_s1 + $0x10] sm:$0xff] (!%p218_p9)   ;;  %vm356_vm1 = vcmask (!%p218_p9), 1043456  }
   0xf   : > { %2177 = vmatpush3.bf16.msra.mxu0 (!%p218_p9), %v2842_v0  ;;  %2191 = vmatpush3.bf16.msra.mxu1 (!%p218_p9), %v2849_v2  ;;  %v2887_v7 = vld [vmem:[%s3458_s1 + $0x3c] sm:$0xff] (!%p218_p9)   ;;  %v2681_v9 = vld [vmem:[%s3458_s1 + $0x44] ss:$0 sps:$4 sm:$0xff] (!%p218_p9)   ;;  %vm312_vm2 = vsmask.f32 (!%p218_p9), 7424  ;;  %vm352_vm3 = vcmask (!%p218_p9), 588800  }
  0x10   : > { %2178 = vmatprep.subr.bf16.mxu0 (!%p218_p9), %v2752_v1  ;;  %2192 = vmatprep.subr.bf16.mxu1 (!%p218_p9), %v2752_v1  ;;  %v2892_v8 = vld [vmem:[%s3458_s1 + $0x18] sm:$0xff] (!%p218_p9)   ;;  %v2682_v10 = vld [vmem:[%s3458_s1 + $0x20] ss:$0 sps:$4 sm:$0xff] (!%p218_p9)   ;;  %v2920_v16 = vsel (!%p218_p9), %vm356_vm1, %v2681_v9, 0  ;;  %v2935_v24 = vld [vmem:[%s3458_s1 + $0x48] sm:$0xff] (!%p218_p9)   ;;  %vm476_vm4 = vcmask (!%p218_p9), 1046528  }
  0x11   : > { %2186 = vmatprep.mubr.msk.bf16.mxu0 (!%p218_p9), %vm2753_vm0, %v2752_v1  ;;  %2200 = vmatprep.mubr.msk.bf16.mxu1 (!%p218_p9), %vm2753_vm0, %v2752_v1  ;;  %v2927_v20 = vsel (!%p218_p9), %vm356_vm1, %v2682_v10, 0  ;;  %v2949_v28 = vld [vmem:[%s3458_s1 + $0x50] sm:$0xff] (!%p218_p9)   ;;  %v2965_v31 = vld [vmem:[%s3458_s1 + $0x58] sm:$0xff] (!%p218_p9)   ;;  %v2975_v34 = vld [vmem:[%s3458_s1 + $0x60] sm:$0xff] (!%p218_p9)   ;;  %s245_s20 = sand.u32 (!%p218_p9), 1, %s2742_s22   ;;  %s1995_s9 = sshll.u32 (!%p218_p9), %s2812_s25, 7 }
  0x12   : > { %v2687_v38 = vld [vmem:[%s3458_s1 + $0x68] ss:$0 sps:$4 sm:$0xff] (!%p218_p9)   ;;  %s1932_s26 = sshll.u32 (!%p218_p9), %s245_s20, 3  ;;  %s3415_s14 = scalar_lea.hbm (!%p218_p9), %s3463_s6, %s1995_s9 }
  0x13   : > { %2179 = vmatpush3.bf16.msra.mxu0 (!%p218_p9), %v2855_v3  ;;  %2193 = vmatpush3.bf16.msra.mxu1 (!%p218_p9), %v2862_v4  ;;  %v2990_v43 = vsel (!%p218_p9), %vm356_vm1, %v2687_v38, 0  ;;  %s247_s10 = scalar_lea.vmem (!%p218_p9), [#allocation3], %s1932_s26  ;;  %s1856_s15 = scalar_lea.sflag (!%p218_p9), [#allocation4], %s245_s20 }
  0x14   : > { %2180 = vmatprep.subr.bf16.mxu0 (!%p218_p9), %v2752_v1  ;;  %2194 = vmatprep.subr.bf16.mxu1 (!%p218_p9), %v2752_v1  ;;  %s2755_s25 = smov (!%p218_p9), [#allocation3]  }
  0x15   : > { %s3471_s17 = smov (!%p249_p10, %s1933_s17), 15  ;;  %s2692_s18 = sshll.u32 %s2755_s25, 4  ;;  %s2693_s18 = int_to_ptr.vmem [resolvable:$false] %s2692_s18 }
  0x16   : > { %s2630_s11 = smul.u32 24, %s3471_s17 }
  0x17   : > { %2181 = vmatpush3.bf16.msra.mxu0 %v2874_v5  ;;  %2195 = vmatpush3.bf16.msra.mxu1 %v2881_v6 }
  0x18   : > { %2182 = vmatprep.subr.bf16.mxu0 %v2752_v1  ;;  %s2906_s19 = scalar_lea.vmem %s3457_s0, %s2630_s11  ;;  %2196 = vmatprep.subr.bf16.mxu1 %v2752_v1  ;;  %s1869_s11 = sshll.u32 %s247_s10, 4  ;;  %s3417_s11 = int_to_ptr.vmem [resolvable:$true] %s1869_s11 }
  0x19   : > { %v256_v11 = vld [vmem:[%s2906_s19] sm:$0xff]  ;;  %v257_v12 = vld [vmem:[%s2906_s19 + $0x8] sm:$0xff]  ;;  %v258_v13 = vld [vmem:[%s2906_s19 + $0x10] sm:$0x3]  ;;  %s2688_s16 = scalar_lea.vmem %s3417_s11, 128  ;;  %p2695_p0 = scmp.lt.s32.totalorder %s3417_s11, %s2693_s18 }
  0x1a   : > { %v2912_v14 = vpack.c.bf16 %v257_v12, %v256_v11  ;;  %v2914_v15 = vpack.c.bf16 %v258_v13, %v258_v13  ;;  %v259_v25 = vld [vmem:[%s2906_s19 + $0x18] sm:$0xff]  ;;  %v260_v26 = vld [vmem:[%s2906_s19 + $0x20] sm:$0xff]  ;;  %v261_v30 = vld [vmem:[%s2906_s19 + $0x28] sm:$0x3]  ;;  %p2689_p11 = scmp.ne.s32.totalorder %s3417_s11, %s2688_s16 }
  0x1b   : > { %2183 = vmatpush3.bf16.msra.mxu0 %v2887_v7  ;;  %2197 = vmatpush3.bf16.msra.mxu1 %v2892_v8  ;;  %v2951_v29 = vpack.c.bf16 %v260_v26, %v259_v25  ;;  %v569_v32 = vpack.c.bf16 %v261_v30, %v261_v30  ;;  %v262_v49 = vld [vmem:[%s2906_s19 + $0x30] sm:$0xff]  ;;  %v263_v50 = vld [vmem:[%s2906_s19 + $0x38] sm:$0xff]  ;;  %v264_v52 = vld [vmem:[%s2906_s19 + $0x40] sm:$0x3] }
  0x1c   : > { %2184 = vmatprep.subr.bf16.mxu0 %v2752_v1  ;;  %v314_v17 = vshrl.u32 %v2912_v14, 16  ;;  %v316_v18 = vshll.u32 %v2912_v14, 16  ;;  %v321_v19 = vshll.u32 %v2914_v15, 16  ;;  %2198 = vmatprep.subr.bf16.mxu1 %v2752_v1  ;;  %v477_v39 = vrot.slane %v2912_v14, 1  ;;  %v265_v61 = vld [vmem:[%s2906_s19 + $0x48] sm:$0xff]  ;;  %v266_v62 = vld [vmem:[%s2906_s19 + $0x50] sm:$0xff]  ;;  %p2690_p12 = pnand %p2689_p11, %p2829_p5 }
  0x1d   : > { %v573_v33 = vshll.u32 %v2951_v29, 16  ;;  %v571_v35 = vshrl.u32 %v2951_v29, 16  ;;  %v578_v37 = vshll.u32 %v569_v32, 16  ;;  %v478_v40 = vrot.slane %v2914_v15, 1  ;;  %v267_v9 = vld [vmem:[%s2906_s19 + $0x58] sm:$0x3] }
  0x1e   : > { %v318_v21 = vrot.slane %v316_v18, 1  ;;  %v323_v22 = vrot.slane %v321_v19, 1  ;;  %v671_v46 = vrot.slane %v2951_v29, 1  ;;  %v672_v47 = vrot.slane %v569_v32, 1  ;;  %v270_v32 = vld [vmem:[%s2906_s19 + $0x70] sm:$0x3]  ;;  %p2691_p13 = pneg %p2690_p12 }
  0x1f   : > { %2185 = vmatpush3.bf16.msra.mxu0 %v2920_v16  ;;  %2199 = vmatpush3.bf16.msra.mxu1 %v2927_v20  ;;  %v575_v36 = vrot.slane %v573_v33, 1  ;;  %v580_v42 = vrot.slane %v578_v37, 1  ;;  %v479_v44 = vsel %vm476_vm4, %v477_v39, %v478_v40  ;;  %v3033_v51 = vpack.c.bf16 %v263_v50, %v262_v49 }
  0x20   : > { %v319_v23 = vor.u32 %v318_v21, %v314_v17  ;;  %2204 = vmatprep.subr.bf16.mxu0 %v2752_v1  ;;  %2218 = vmatprep.subr.bf16.mxu1 %v2752_v1  ;;  %v673_v48 = vsel %vm476_vm4, %v671_v46, %v672_v47  ;;  %v727_v53 = vpack.c.bf16 %v264_v52, %v264_v52  ;;  %v273_v46 = vld [vmem:[%s2906_s19 + $0x88] sm:$0x3] }
  0x21   : > { %v576_v41 = vor.u32 %v575_v36, %v571_v35  ;;  %v731_v54 = vshll.u32 %v3033_v51, 16  ;;  %v729_v55 = vshrl.u32 %v3033_v51, 16  ;;  %v884_v63 = vpack.c.bf16 %v266_v62, %v265_v61  ;;  %v274_v61 = vld [vmem:[%s2906_s19 + $0x90] sm:$0xff]  ;;  %v275_v62 = vld [vmem:[%s2906_s19 + $0x98] sm:$0xff] }
  0x22   : > { %v324_v27 = vsel %vm312_vm2, %v319_v23, %v323_v22  ;;  %2201 = vmatmul.mubr.msk.bf16.vlgmr.msra.gmra.mrb[0].mxu1 %vm352_vm3, %v2912_v14  ;;  %v736_v57 = vshll.u32 %v727_v53, 16  ;;  %v885_v10 = vpack.c.bf16 %v267_v9, %v267_v9  ;;  %v829_v15 = vrot.slane %v3033_v51, 1  ;;  %v276_v9 = vld [vmem:[%s2906_s19 + $0xa0] sm:$0x3] }
  0x23   : > { %2187 = vmatmul.mubr.msk.bf16.vlgmr.msra.gmra.mrb[0].mxu0 %vm352_vm3, %v324_v27  ;;  %2219 = vmatpush3.bf16.msra.mxu1 %v2842_v0  ;;  %v581_v45 = vsel %vm312_vm2, %v576_v41, %v580_v42  ;;  %v733_v56 = vrot.slane %v731_v54, 1  ;;  %v889_v11 = vshll.u32 %v884_v63, 16  ;;  %v887_v12 = vshrl.u32 %v884_v63, 16  ;;  %v268_v27 = vld [vmem:[%s2906_s19 + $0x60] sm:$0xff]  ;;  %v271_v42 = vld [vmem:[%s2906_s19 + $0x78] sm:$0xff] }
  0x24   : > { %2205 = vmatpush3.bf16.msra.mxu0 %v2935_v24  ;;  %2220 = vmatprep.subr.bf16.mxu1 %v2752_v1  ;;  %v738_v59 = vrot.slane %v736_v57, 1  ;;  %v894_v14 = vshll.u32 %v885_v10, 16  ;;  %v830_v17 = vrot.slane %v727_v53, 1  ;;  %v987_v23 = vrot.slane %v884_v63, 1 }
  0x25   : > { %2206 = vmatprep.subr.bf16.mxu0 %v2752_v1  ;;  %2214 = vmatprep.mubr.msk.bf16.mxu0 %vm2753_vm0, %v2752_v1  ;;  %v734_v58 = vor.u32 %v733_v56, %v729_v55  ;;  %v891_v13 = vrot.slane %v889_v11, 1  ;;  %v988_v25 = vrot.slane %v885_v10, 1  ;;  %v1043_v33 = vpack.c.bf16 %v270_v32, %v270_v32 }
  0x26   : > { %2228 = vmatprep.mubr.msk.bf16.mxu1 %vm2753_vm0, %v2752_v1  ;;  %v896_v19 = vrot.slane %v894_v14, 1  ;;  %v831_v21 = vsel %vm476_vm4, %v829_v15, %v830_v17  ;;  %v1201_v47 = vpack.c.bf16 %v273_v46, %v273_v46  ;;  %v1359_v10 = vpack.c.bf16 %v276_v9, %v276_v9 }
  0x27   : > { %2221 = vmatpush3.bf16.msra.mxu1 %v2855_v3  ;;  %v739_v60 = vsel %vm312_vm2, %v734_v58, %v738_v59  ;;  %v892_v18 = vor.u32 %v891_v13, %v887_v12  ;;  %v989_v26 = vsel %vm476_vm4, %v987_v23, %v988_v25  ;;  %v1052_v38 = vshll.u32 %v1043_v33, 16  ;;  %v279_v23 = vld [vmem:[%s2906_s19 + $0xb8] sm:$0x3] }
  0x28   : > { %2207 = vmatpush3.bf16.msra.mxu0 %v2949_v28  ;;  %2222 = vmatprep.subr.bf16.mxu1 %v2752_v1  ;;  %v1146_v53 = vrot.slane %v1043_v33, 1  ;;  %v1304_v59 = vrot.slane %v1201_v47, 1  ;;  %v1368_v14 = vshll.u32 %v1359_v10, 16  ;;  %v1517_v25 = vpack.c.bf16 %v279_v23, %v279_v23 }
  0x29   : > { %2208 = vmatprep.subr.bf16.mxu0 %v2752_v1  ;;  %v897_v22 = vsel %vm312_vm2, %v892_v18, %v896_v19  ;;  %v1054_v40 = vrot.slane %v1052_v38, 1  ;;  %v277_v19 = vld [vmem:[%s2906_s19 + $0xa8] sm:$0xff] }
  0x2a   : > { %v1370_v17 = vrot.slane %v1368_v14, 1 }
  0x2b   : > { %2223 = vmatpush3.bf16.msra.mxu1 %v2874_v5 }
  0x2c   : > { %2209 = vmatpush3.bf16.msra.mxu0 %v2965_v31  ;;  %2224 = vmatprep.subr.bf16.mxu1 %v2752_v1 }
  0x2d   : > { %2210 = vmatprep.subr.bf16.mxu0 %v2752_v1 }
  0x2f   : > { %2225 = vmatpush3.bf16.msra.mxu1 %v2887_v7 }
  0x30   : > { %2211 = vmatpush3.bf16.msra.mxu0 %v2975_v34  ;;  %2226 = vmatprep.subr.bf16.mxu1 %v2752_v1 }
  0x31   : > { %2212 = vmatprep.subr.bf16.mxu0 %v2752_v1 }
  0x33   : > { %2227 = vmatpush3.bf16.msra.mxu1 %v2920_v16 }
  0x34   : > { %2213 = vmatpush3.bf16.msra.mxu0 %v2990_v43  ;;  %2246 = vmatprep.subr.bf16.mxu1 %v2752_v1 }
  0x35   : > { %2232 = vmatprep.subr.bf16.mxu0 %v2752_v1 }
  0x36   : > { %2229 = vmatmul.mubr.msk.bf16.vlgmr.msra.gmra.mrb[4].mxu1 %vm352_vm3, %v581_v45 }
  0x37   : > { %2215 = vmatmul.mubr.msk.bf16.vlgmr.msra.gmra.mrb[4].mxu0 %vm352_vm3, %v479_v44  ;;  %2247 = vmatpush3.bf16.msra.mxu1 %v2935_v24  ;;  %v272_v44 = vld [vmem:[%s2906_s19 + $0x80] sm:$0xff] }
  0x38   : > { %2233 = vmatpush3.bf16.msra.mxu0 %v2849_v2  ;;  %2248 = vmatprep.subr.bf16.mxu1 %v2752_v1  ;;  %v1200_v45 = vpack.c.bf16 %v272_v44, %v271_v42 }
  0x39   : > { %2234 = vmatprep.subr.bf16.mxu0 %v2752_v1  ;;  %2242 = vmatprep.mubr.msk.bf16.mxu0 %vm2753_vm0, %v2752_v1 }
  0x3a   : > { %2256 = vmatprep.mubr.msk.bf16.mxu1 %vm2753_vm0, %v2752_v1  ;;  %v1203_v49 = vshrl.u32 %v1200_v45, 16  ;;  %v1303_v58 = vrot.slane %v1200_v45, 1 }
  0x3b   : > { %2249 = vmatpush3.bf16.msra.mxu1 %v2949_v28 }
  0x3c   : > { %2235 = vmatpush3.bf16.msra.mxu0 %v2862_v4  ;;  %2250 = vmatprep.subr.bf16.mxu1 %v2752_v1 }
  0x3d   : > { %2236 = vmatprep.subr.bf16.mxu0 %v2752_v1 }
  0x3f   : > { %2251 = vmatpush3.bf16.msra.mxu1 %v2965_v31 }
  0x40   : > { %2237 = vmatpush3.bf16.msra.mxu0 %v2881_v6  ;;  %2252 = vmatprep.subr.bf16.mxu1 %v2752_v1 }
  0x41   : > { %2238 = vmatprep.subr.bf16.mxu0 %v2752_v1 }
  0x43   : > { %2253 = vmatpush3.bf16.msra.mxu1 %v2975_v34 }
  0x44   : > { %2239 = vmatpush3.bf16.msra.mxu0 %v2892_v8  ;;  %2254 = vmatprep.subr.bf16.mxu1 %v2752_v1 }
  0x45   : > { %2240 = vmatprep.subr.bf16.mxu0 %v2752_v1 }
  0x47   : > { %2255 = vmatpush3.bf16.msra.mxu1 %v2990_v43 }
  0x48   : > { %2241 = vmatpush3.bf16.msra.mxu0 %v2927_v20  ;;  %2274 = vmatprep.subr.bf16.mxu1 %v2752_v1 }
  0x49   : > { %2260 = vmatprep.subr.bf16.mxu0 %v2752_v1 }
  0x4a   : > { %2257 = vmatmul.mubr.msk.bf16.vlgmr.msra.gmra.mrb[8].mxu1 %vm352_vm3, %v673_v48  ;;  %v1205_v48 = vshll.u32 %v1200_v45, 16 }
  0x4b   : > { %2243 = vmatmul.mubr.msk.bf16.vlgmr.msra.gmra.mrb[8].mxu0 %vm352_vm3, %v2951_v29  ;;  %2275 = vmatpush3.bf16.msra.mxu1 %v2849_v2  ;;  %v269_v29 = vld [vmem:[%s2906_s19 + $0x68] sm:$0xff] }
  0x4c   : > { %2261 = vmatpush3.bf16.msra.mxu0 %v2842_v0  ;;  %2276 = vmatprep.subr.bf16.mxu1 %v2752_v1  ;;  %v3127_v30 = vpack.c.bf16 %v269_v29, %v268_v27  ;;  %v1207_v50 = vrot.slane %v1205_v48, 1  ;;  %v1526_v29 = vshll.u32 %v1517_v25, 16 }
  0x4d   : > { %2262 = vmatprep.subr.bf16.mxu0 %v2752_v1  ;;  %2270 = vmatprep.mubr.msk.bf16.mxu0 %vm2753_vm0, %v2752_v1 }
  0x4e   : > { %2284 = vmatprep.mubr.msk.bf16.mxu1 %vm2753_vm0, %v2752_v1  ;;  %v1047_v35 = vshll.u32 %v3127_v30, 16  ;;  %v1045_v36 = vshrl.u32 %v3127_v30, 16  ;;  %v1145_v52 = vrot.slane %v3127_v30, 1  ;;  %v1208_v54 = vor.u32 %v1207_v50, %v1203_v49 }
  0x4f   : > { %2277 = vmatpush3.bf16.msra.mxu1 %v2862_v4  ;;  %v1528_v33 = vrot.slane %v1526_v29, 1 }
  0x50   : > { %2263 = vmatpush3.bf16.msra.mxu0 %v2855_v3  ;;  %2278 = vmatprep.subr.bf16.mxu1 %v2752_v1  ;;  %v1049_v37 = vrot.slane %v1047_v35, 1  ;;  %v1147_v56 = vsel %vm476_vm4, %v1145_v52, %v1146_v53 }
  0x51   : > { %2264 = vmatprep.subr.bf16.mxu0 %v2752_v1 }
  0x52   : > { %v1050_v39 = vor.u32 %v1049_v37, %v1045_v36 }
  0x53   : > { %2279 = vmatpush3.bf16.msra.mxu1 %v2881_v6 }
  0x54   : > { %2265 = vmatpush3.bf16.msra.mxu0 %v2874_v5  ;;  %2280 = vmatprep.subr.bf16.mxu1 %v2752_v1  ;;  %v1055_v41 = vsel %vm312_vm2, %v1050_v39, %v1054_v40 }
  0x55   : > { %2266 = vmatprep.subr.bf16.mxu0 %v2752_v1 }
  0x57   : > { %2281 = vmatpush3.bf16.msra.mxu1 %v2892_v8 }
  0x58   : > { %2267 = vmatpush3.bf16.msra.mxu0 %v2887_v7  ;;  %2282 = vmatprep.subr.bf16.mxu1 %v2752_v1 }
  0x59   : > { %2268 = vmatprep.subr.bf16.mxu0 %v2752_v1 }
  0x5b   : > { %2283 = vmatpush3.bf16.msra.mxu1 %v2927_v20 }
  0x5c   : > { %2269 = vmatpush3.bf16.msra.mxu0 %v2920_v16  ;;  %2302 = vmatprep.subr.bf16.mxu1 %v2752_v1 }
  0x5d   : > { %2288 = vmatprep.subr.bf16.mxu0 %v2752_v1 }
  0x5e   : > { %2285 = vmatmul.mubr.msk.bf16.vlgmr.msra.gmra.mrb[12].mxu1 %vm352_vm3, %v3033_v51  ;;  %v1210_v51 = vshll.u32 %v1201_v47, 16 }
  0x5f   : > { %2271 = vmatmul.mubr.msk.bf16.vlgmr.msra.gmra.mrb[12].mxu0 %vm352_vm3, %v739_v60  ;;  %2303 = vmatpush3.bf16.msra.mxu1 %v2842_v0  ;;  %v1305_v60 = vsel %vm476_vm4, %v1303_v58, %v1304_v59 }
  0x60   : > { %2289 = vmatpush3.bf16.msra.mxu0 %v2935_v24  ;;  %2304 = vmatprep.subr.bf16.mxu1 %v2752_v1  ;;  %v1212_v55 = vrot.slane %v1210_v51, 1 }
  0x61   : > { %2290 = vmatprep.subr.bf16.mxu0 %v2752_v1  ;;  %2298 = vmatprep.mubr.msk.bf16.mxu0 %vm2753_vm0, %v2752_v1 }
  0x62   : > { %2312 = vmatprep.mubr.msk.bf16.mxu1 %vm2753_vm0, %v2752_v1  ;;  %v1213_v57 = vsel %vm312_vm2, %v1208_v54, %v1212_v55 }
  0x63   : > { %2305 = vmatpush3.bf16.msra.mxu1 %v2855_v3 }
  0x64   : > { %2291 = vmatpush3.bf16.msra.mxu0 %v2949_v28  ;;  %2306 = vmatprep.subr.bf16.mxu1 %v2752_v1 }
  0x65   : > { %2292 = vmatprep.subr.bf16.mxu0 %v2752_v1 }
  0x67   : > { %2307 = vmatpush3.bf16.msra.mxu1 %v2874_v5 }
  0x68   : > { %2293 = vmatpush3.bf16.msra.mxu0 %v2965_v31  ;;  %2308 = vmatprep.subr.bf16.mxu1 %v2752_v1 }
  0x69   : > { %2294 = vmatprep.subr.bf16.mxu0 %v2752_v1 }
  0x6b   : > { %2309 = vmatpush3.bf16.msra.mxu1 %v2887_v7 }
  0x6c   : > { %2295 = vmatpush3.bf16.msra.mxu0 %v2975_v34  ;;  %2310 = vmatprep.subr.bf16.mxu1 %v2752_v1 }
  0x6d   : > { %2296 = vmatprep.subr.bf16.mxu0 %v2752_v1 }
  0x6f   : > { %2311 = vmatpush3.bf16.msra.mxu1 %v2920_v16 }
  0x70   : > { %2297 = vmatpush3.bf16.msra.mxu0 %v2990_v43  ;;  %2330 = vmatprep.subr.bf16.mxu1 %v2752_v1 }
  0x71   : > { %2316 = vmatprep.subr.bf16.mxu0 %v2752_v1 }
  0x72   : > { %2313 = vmatmul.mubr.msk.bf16.vlgmr.msra.gmra.mrb[16].mxu1 %vm352_vm3, %v897_v22 }
  0x73   : > { %2299 = vmatmul.mubr.msk.bf16.vlgmr.msra.gmra.mrb[16].mxu0 %vm352_vm3, %v831_v21  ;;  %2331 = vmatpush3.bf16.msra.mxu1 %v2935_v24  ;;  %v278_v21 = vld [vmem:[%s2906_s19 + $0xb0] sm:$0xff]  ;;  %s2694_s19 = scalar_lea.vmem %s2693_s18, 256 }
  0x74   : > { %2317 = vmatpush3.bf16.msra.mxu0 %v2849_v2  ;;  %2332 = vmatprep.subr.bf16.mxu1 %v2752_v1  ;;  %v3256_v22 = vpack.c.bf16 %v278_v21, %v277_v19  ;;  %p2696_p1 = scmp.lt.s32.totalorder %s2694_s19, %s2688_s16 }
  0x75   : > { %2318 = vmatprep.subr.bf16.mxu0 %v2752_v1  ;;  %2326 = vmatprep.mubr.msk.bf16.mxu0 %vm2753_vm0, %v2752_v1 }
  0x76   : > { %2340 = vmatprep.mubr.msk.bf16.mxu1 %vm2753_vm0, %v2752_v1  ;;  %p2697_p2 = por %p2696_p1, %p2695_p0 }
  0x77   : > { %2333 = vmatpush3.bf16.msra.mxu1 %v2949_v28 }
  0x78   : > { %2319 = vmatpush3.bf16.msra.mxu0 %v2862_v4  ;;  %2334 = vmatprep.subr.bf16.mxu1 %v2752_v1  ;;  %p2698_p3 = pnand %p2697_p2, %p2691_p13 }
  0x79   : > { %2320 = vmatprep.subr.bf16.mxu0 %v2752_v1 }
  0x7b   : > { %2335 = vmatpush3.bf16.msra.mxu1 %v2965_v31 }
  0x7c   : > { %2321 = vmatpush3.bf16.msra.mxu0 %v2881_v6  ;;  %2336 = vmatprep.subr.bf16.mxu1 %v2752_v1 }
  0x7d   : > { %2322 = vmatprep.subr.bf16.mxu0 %v2752_v1 }
  0x7f   : > { %2337 = vmatpush3.bf16.msra.mxu1 %v2975_v34 }
  0x80   : > { %2323 = vmatpush3.bf16.msra.mxu0 %v2892_v8  ;;  %2338 = vmatprep.subr.bf16.mxu1 %v2752_v1 }
  0x81   : > { %2324 = vmatprep.subr.bf16.mxu0 %v2752_v1 }
  0x83   : > { %2339 = vmatpush3.bf16.msra.mxu1 %v2990_v43 }
  0x84   : > { %2325 = vmatpush3.bf16.msra.mxu0 %v2927_v20  ;;  %2358 = vmatprep.subr.bf16.mxu1 %v2752_v1 }
  0x85   : > { %2344 = vmatprep.subr.bf16.mxu0 %v2752_v1 }
  0x86   : > { %2341 = vmatmul.mubr.msk.bf16.vlgmr.msra.gmra.mrb[20].mxu1 %vm352_vm3, %v989_v26  ;;  %v1519_v26 = vshrl.u32 %v3256_v22, 16 }
  0x87   : > { %2327 = vmatmul.mubr.msk.bf16.vlgmr.msra.gmra.mrb[20].mxu0 %vm352_vm3, %v884_v63  ;;  %2359 = vmatpush3.bf16.msra.mxu1 %v2849_v2  ;;  %v3221_v63 = vpack.c.bf16 %v275_v62, %v274_v61 }
  0x88   : > { %2345 = vmatpush3.bf16.msra.mxu0 %v2842_v0  ;;  %2360 = vmatprep.subr.bf16.mxu1 %v2752_v1 }
  0x89   : > { %2346 = vmatprep.subr.bf16.mxu0 %v2752_v1  ;;  %2354 = vmatprep.mubr.msk.bf16.mxu0 %vm2753_vm0, %v2752_v1  ;;  %v1363_v11 = vshll.u32 %v3221_v63, 16  ;;  %v1361_v12 = vshrl.u32 %v3221_v63, 16 }
  0x8a   : > { %2368 = vmatprep.mubr.msk.bf16.mxu1 %vm2753_vm0, %v2752_v1 }
  0x8b   : > { %2361 = vmatpush3.bf16.msra.mxu1 %v2862_v4  ;;  %v1365_v13 = vrot.slane %v1363_v11, 1 }
  0x8c   : > { %2347 = vmatpush3.bf16.msra.mxu0 %v2855_v3  ;;  %2362 = vmatprep.subr.bf16.mxu1 %v2752_v1 }
  0x8d   : > { %2348 = vmatprep.subr.bf16.mxu0 %v2752_v1  ;;  %v1366_v15 = vor.u32 %v1365_v13, %v1361_v12 }
  0x8f   : > { %2363 = vmatpush3.bf16.msra.mxu1 %v2881_v6  ;;  %v1371_v18 = vsel %vm312_vm2, %v1366_v15, %v1370_v17 }
  0x90   : > { %2349 = vmatpush3.bf16.msra.mxu0 %v2874_v5  ;;  %2364 = vmatprep.subr.bf16.mxu1 %v2752_v1 }
  0x91   : > { %2350 = vmatprep.subr.bf16.mxu0 %v2752_v1 }
  0x93   : > { %2365 = vmatpush3.bf16.msra.mxu1 %v2892_v8 }
  0x94   : > { %2351 = vmatpush3.bf16.msra.mxu0 %v2887_v7  ;;  %2366 = vmatprep.subr.bf16.mxu1 %v2752_v1 }
  0x95   : > { %2352 = vmatprep.subr.bf16.mxu0 %v2752_v1 }
  0x97   : > { %2367 = vmatpush3.bf16.msra.mxu1 %v2927_v20 }
  0x98   : > { %2353 = vmatpush3.bf16.msra.mxu0 %v2920_v16  ;;  %2386 = vmatprep.subr.bf16.mxu1 %v2752_v1 }
  0x99   : > { %2372 = vmatprep.subr.bf16.mxu0 %v2752_v1 }
  0x9a   : > { %2369 = vmatmul.mubr.msk.bf16.vlgmr.msra.gmra.mrb[24].mxu1 %vm352_vm3, %v3127_v30  ;;  %v1462_v30 = vrot.slane %v1359_v10, 1 }
  0x9b   : > { %2355 = vmatmul.mubr.msk.bf16.vlgmr.msra.gmra.mrb[24].mxu0 %vm352_vm3, %v1055_v41  ;;  %2387 = vmatpush3.bf16.msra.mxu1 %v2842_v0  ;;  %v2754_v41 = vmov 0.0|0.0  }
  0x9c   : > { %2373 = vmatpush3.bf16.msra.mxu0 %v2935_v24  ;;  %2388 = vmatprep.subr.bf16.mxu1 %v2752_v1 }
  0x9d   : > { %2374 = vmatprep.subr.bf16.mxu0 %v2752_v1  ;;  %2382 = vmatprep.mubr.msk.bf16.mxu0 %vm2753_vm0, %v2752_v1 }
  0x9e   : > { %2396 = vmatprep.mubr.msk.bf16.mxu1 %vm2753_vm0, %v2752_v1 }
  0x9f   : > { %2389 = vmatpush3.bf16.msra.mxu1 %v2855_v3 }
  0xa0   : > { %2375 = vmatpush3.bf16.msra.mxu0 %v2949_v28  ;;  %2390 = vmatprep.subr.bf16.mxu1 %v2752_v1 }
  0xa1   : > { %2376 = vmatprep.subr.bf16.mxu0 %v2752_v1 }
  0xa3   : > { %2391 = vmatpush3.bf16.msra.mxu1 %v2874_v5 }
  0xa4   : > { %2377 = vmatpush3.bf16.msra.mxu0 %v2965_v31  ;;  %2392 = vmatprep.subr.bf16.mxu1 %v2752_v1 }
  0xa5   : > { %2378 = vmatprep.subr.bf16.mxu0 %v2752_v1 }
  0xa7   : > { %2393 = vmatpush3.bf16.msra.mxu1 %v2887_v7 }
  0xa8   : > { %2379 = vmatpush3.bf16.msra.mxu0 %v2975_v34  ;;  %2394 = vmatprep.subr.bf16.mxu1 %v2752_v1 }
  0xa9   : > { %2380 = vmatprep.subr.bf16.mxu0 %v2752_v1 }
  0xab   : > { %2395 = vmatpush3.bf16.msra.mxu1 %v2920_v16 }
  0xac   : > { %2381 = vmatpush3.bf16.msra.mxu0 %v2990_v43  ;;  %2414 = vmatprep.subr.bf16.mxu1 %v2752_v1 }
  0xad   : > { %2400 = vmatprep.subr.bf16.mxu0 %v2752_v1 }
  0xae   : > { %2397 = vmatmul.mubr.msk.bf16.vlgmr.msra.gmra.mrb[28].mxu1 %vm352_vm3, %v1213_v57 }
  0xaf   : > { %2383 = vmatmul.mubr.msk.bf16.vlgmr.msra.gmra.mrb[28].mxu0 %vm352_vm3, %v1147_v56  ;;  %2415 = vmatpush3.bf16.msra.mxu1 %v2935_v24 }
  0xb0   : > { %2401 = vmatpush3.bf16.msra.mxu0 %v2849_v2  ;;  %2416 = vmatprep.subr.bf16.mxu1 %v2752_v1 }
  0xb1   : > { %2402 = vmatprep.subr.bf16.mxu0 %v2752_v1  ;;  %2410 = vmatprep.mubr.msk.bf16.mxu0 %vm2753_vm0, %v2752_v1 }
  0xb2   : > { %2424 = vmatprep.mubr.msk.bf16.mxu1 %vm2753_vm0, %v2752_v1 }
  0xb3   : > { %2417 = vmatpush3.bf16.msra.mxu1 %v2949_v28 }
  0xb4   : > { %2403 = vmatpush3.bf16.msra.mxu0 %v2862_v4  ;;  %2418 = vmatprep.subr.bf16.mxu1 %v2752_v1 }
  0xb5   : > { %2404 = vmatprep.subr.bf16.mxu0 %v2752_v1 }
  0xb7   : > { %2419 = vmatpush3.bf16.msra.mxu1 %v2965_v31 }
  0xb8   : > { %2405 = vmatpush3.bf16.msra.mxu0 %v2881_v6  ;;  %2420 = vmatprep.subr.bf16.mxu1 %v2752_v1 }
  0xb9   : > { %2406 = vmatprep.subr.bf16.mxu0 %v2752_v1 }
  0xbb   : > { %2421 = vmatpush3.bf16.msra.mxu1 %v2975_v34 }
  0xbc   : > { %2407 = vmatpush3.bf16.msra.mxu0 %v2892_v8  ;;  %2422 = vmatprep.subr.bf16.mxu1 %v2752_v1 }
  0xbd   : > { %2408 = vmatprep.subr.bf16.mxu0 %v2752_v1 }
  0xbf   : > { %2423 = vmatpush3.bf16.msra.mxu1 %v2990_v43 }
  0xc0   : > { %2409 = vmatpush3.bf16.msra.mxu0 %v2927_v20  ;;  %2442 = vmatprep.subr.bf16.mxu1 %v2752_v1 }
  0xc1   : > { %2428 = vmatprep.subr.bf16.mxu0 %v2752_v1 }
  0xc2   : > { %2425 = vmatmul.mubr.msk.bf16.vlgmr.msra.gmra.mrb[32].mxu1 %vm352_vm3, %v1305_v60 }
  0xc3   : > { %2411 = vmatmul.mubr.msk.bf16.vlgmr.msra.gmra.mrb[32].mxu0 %vm352_vm3, %v1200_v45  ;;  %2443 = vmatpush3.bf16.msra.mxu1 %v2849_v2 }
  0xc4   : > { %2429 = vmatpush3.bf16.msra.mxu0 %v2842_v0  ;;  %2444 = vmatprep.subr.bf16.mxu1 %v2752_v1 }
  0xc5   : > { %2430 = vmatprep.subr.bf16.mxu0 %v2752_v1  ;;  %2438 = vmatprep.mubr.msk.bf16.mxu0 %vm2753_vm0, %v2752_v1 }
  0xc6   : > { %2452 = vmatprep.mubr.msk.bf16.mxu1 %vm2753_vm0, %v2752_v1 }
  0xc7   : > { %2445 = vmatpush3.bf16.msra.mxu1 %v2862_v4 }
  0xc8   : > { %2431 = vmatpush3.bf16.msra.mxu0 %v2855_v3  ;;  %2446 = vmatprep.subr.bf16.mxu1 %v2752_v1 }
  0xc9   : > { %2432 = vmatprep.subr.bf16.mxu0 %v2752_v1 }
  0xcb   : > { %2447 = vmatpush3.bf16.msra.mxu1 %v2881_v6 }
  0xcc   : > { %2433 = vmatpush3.bf16.msra.mxu0 %v2874_v5  ;;  %2448 = vmatprep.subr.bf16.mxu1 %v2752_v1 }
  0xcd   : > { %2434 = vmatprep.subr.bf16.mxu0 %v2752_v1 }
  0xcf   : > { %2449 = vmatpush3.bf16.msra.mxu1 %v2892_v8 }
  0xd0   : > { %2435 = vmatpush3.bf16.msra.mxu0 %v2887_v7  ;;  %2450 = vmatprep.subr.bf16.mxu1 %v2752_v1 }
  0xd1   : > { %2436 = vmatprep.subr.bf16.mxu0 %v2752_v1 }
  0xd3   : > { %2451 = vmatpush3.bf16.msra.mxu1 %v2927_v20 }
  0xd4   : > { %2437 = vmatpush3.bf16.msra.mxu0 %v2920_v16  ;;  %2470 = vmatprep.subr.bf16.mxu1 %v2752_v1 }
  0xd5   : > { %2456 = vmatprep.subr.bf16.mxu0 %v2752_v1 }
  0xd6   : > { %2453 = vmatmul.mubr.msk.bf16.vlgmr.msra.gmra.mrb[36].mxu1 %vm352_vm3, %v3221_v63 }
  0xd7   : > { %2439 = vmatmul.mubr.msk.bf16.vlgmr.msra.gmra.mrb[36].mxu0 %vm352_vm3, %v1371_v18  ;;  %2471 = vmatpush3.bf16.msra.mxu1 %v2842_v0  ;;  %v1521_v0 = vshll.u32 %v3256_v22, 16 }
  0xd8   : > { %2457 = vmatpush3.bf16.msra.mxu0 %v2935_v24  ;;  %2472 = vmatprep.subr.bf16.mxu1 %v2752_v1 }
  0xd9   : > { %2458 = vmatprep.subr.bf16.mxu0 %v2752_v1  ;;  %2466 = vmatprep.mubr.msk.bf16.mxu0 %vm2753_vm0, %v2752_v1  ;;  %v1523_v27 = vrot.slane %v1521_v0, 1 }
  0xda   : > { %2480 = vmatprep.mubr.msk.bf16.mxu1 %vm2753_vm0, %v2752_v1 }
  0xdb   : > { %2473 = vmatpush3.bf16.msra.mxu1 %v2855_v3  ;;  %v1461_v3 = vrot.slane %v3221_v63, 1  ;;  %v1524_v32 = vor.u32 %v1523_v27, %v1519_v26 }
  0xdc   : > { %2459 = vmatpush3.bf16.msra.mxu0 %v2949_v28  ;;  %2474 = vmatprep.subr.bf16.mxu1 %v2752_v1 }
  0xdd   : > { %2460 = vmatprep.subr.bf16.mxu0 %v2752_v1  ;;  %v1529_v35 = vsel %vm312_vm2, %v1524_v32, %v1528_v33 }
  0xdf   : > { %2475 = vmatpush3.bf16.msra.mxu1 %v2874_v5  ;;  %v1463_v5 = vsel %vm476_vm4, %v1461_v3, %v1462_v30 }
  0xe0   : > { %2461 = vmatpush3.bf16.msra.mxu0 %v2965_v31  ;;  %2476 = vmatprep.subr.bf16.mxu1 %v2752_v1 }
  0xe1   : > { %2462 = vmatprep.subr.bf16.mxu0 %v2752_v1 }
  0xe3   : > { %2477 = vmatpush3.bf16.msra.mxu1 %v2887_v7 }
  0xe4   : > { %2463 = vmatpush3.bf16.msra.mxu0 %v2975_v34  ;;  %2478 = vmatprep.subr.bf16.mxu1 %v2752_v1 }
  0xe5   : > { %2464 = vmatprep.subr.bf16.mxu0 %v2752_v1 }
  0xe7   : > { %2479 = vmatpush3.bf16.msra.mxu1 %v2920_v16 }
  0xe8   : > { %2465 = vmatpush3.bf16.msra.mxu0 %v2990_v43  ;;  %2498 = vmatprep.subr.bf16.mxu1 %v2752_v1 }
  0xe9   : > { %2484 = vmatprep.subr.bf16.mxu0 %v2752_v1 }
  0xea   : > { %2481 = vmatmul.mubr.msk.bf16.vlgmr.msra.gmra.mrb[40].mxu1 %vm352_vm3, %v1529_v35 }
  0xeb   : > { %2467 = vmatmul.mubr.msk.bf16.vlgmr.msra.gmra.mrb[40].mxu0 %vm352_vm3, %v1463_v5  ;;  %2499 = vmatpush3.bf16.msra.mxu1 %v2935_v24 }
  0xec   : > { %2485 = vmatpush3.bf16.msra.mxu0 %v2849_v2  ;;  %2500 = vmatprep.subr.bf16.mxu1 %v2752_v1 }
  0xed   : > { %2486 = vmatprep.subr.bf16.mxu0 %v2752_v1  ;;  %2494 = vmatprep.mubr.msk.bf16.mxu0 %vm2753_vm0, %v2752_v1 }
  0xee   : > { %2508 = vmatprep.mubr.msk.bf16.mxu1 %vm2753_vm0, %v2752_v1 }
  0xef   : > { %2501 = vmatpush3.bf16.msra.mxu1 %v2949_v28  ;;  %v1619_v28 = vrot.slane %v3256_v22, 1 }
  0xf0   : > { %2487 = vmatpush3.bf16.msra.mxu0 %v2862_v4  ;;  %2502 = vmatprep.subr.bf16.mxu1 %v2752_v1 }
  0xf1   : > { %2488 = vmatprep.subr.bf16.mxu0 %v2752_v1 }
  0xf3   : > { %2503 = vmatpush3.bf16.msra.mxu1 %v2965_v31 }
  0xf4   : > { %2489 = vmatpush3.bf16.msra.mxu0 %v2881_v6  ;;  %2504 = vmatprep.subr.bf16.mxu1 %v2752_v1  ;;  %v1620_v6 = vrot.slane %v1517_v25, 1 }
  0xf5   : > { %2490 = vmatprep.subr.bf16.mxu0 %v2752_v1  ;;  %v467_v7 = vpop.f32.mrb[0].mxu1 }
  0xf6   : > { %v394_v2 = vpop.f32.mrb[0].mxu0  ;;  %v2202_v36 = vpop.f32.mrb[1].mxu1  ;;  %v1621_v40 = vsel %vm476_vm4, %v1619_v28, %v1620_v6 }
  0xf7   : > { %v468_v16 = vadd.f32 %v467_v7, %v394_v2  ;;  %v2188_v24 = vpop.f32.mrb[1].mxu0  ;;  %v470_v37 = vpop.f32.mrb[2].mxu1  ;;  %2505 = vmatpush3.bf16.msra.mxu1 %v2975_v34 }
  0xf8   : > { %v397_v4 = vpop.f32.mrb[2].mxu0  ;;  %2491 = vmatpush3.bf16.msra.mxu0 %v2892_v8  ;;  %v2203_v39 = vpop.f32.mrb[3].mxu1  ;;  %2506 = vmatprep.subr.bf16.mxu1 %v2752_v1  ;;  %v3324_v8 = vld [vmem:[%s3459_s2] ss:$0 sm:$0xff] }
  0xf9   : > { %v471_v38 = vadd.f32 %v470_v37, %v397_v4  ;;  %v2189_v31 = vpop.f32.mrb[3].mxu0  ;;  %2492 = vmatprep.subr.bf16.mxu0 %v2752_v1 }
  0xfb   : > { %2507 = vmatpush3.bf16.msra.mxu1 %v2990_v43 }
  0xfc   : > { %2493 = vmatpush3.bf16.msra.mxu0 %v2927_v20  ;;  %2606 = vmatprep.subr.bf16.mxu1 %v2754_v41 }
  0xfd   : > { %2582 = vmatprep.subr.bf16.mxu0 %v2754_v41 }
  0xfe   : > { %2509 = vmatmul.mubr.msk.bf16.vlgmr.msra.gmra.mrb[44].mxu1 %vm352_vm3, %v1621_v40 }
  0xff   : > { %2495 = vmatmul.mubr.msk.bf16.vlgmr.msra.gmra.mrb[44].mxu0 %vm352_vm3, %v3256_v22  ;;  %2579 = vmatprep.mubr.msk.f32.mxu1 %vm2753_vm0, %v2752_v1 }
 0x100   : > { %2544 = vmatprep.mubr.msk.f32.mxu0 %vm2753_vm0, %v2752_v1 }
 0x109   : > { %v619_v34 = vpop.f32.mrb[4].mxu1 }
 0x10a   : > { %v547_v20 = vpop.f32.mrb[4].mxu0  ;;  %v2230_v44 = vpop.f32.mrb[5].mxu1 }
 0x10b   : > { %v554_v43 = vadd.f32 %v547_v20, %v468_v16  ;;  %v2216_v42 = vpop.f32.mrb[5].mxu0  ;;  %v622_v46 = vpop.f32.mrb[6].mxu1 }
 0x10c   : > { %v550_v45 = vpop.f32.mrb[6].mxu0  ;;  %v2231_v50 = vpop.f32.mrb[7].mxu1 }
 0x10d   : > { %v562_v47 = vadd.f32 %v3324_v8, %v554_v43  ;;  %v555_v48 = vadd.f32 %v550_v45, %v471_v38  ;;  %v2217_v49 = vpop.f32.mrb[7].mxu0  ;;  %v1762_v50 = vld [vmem:[%s3461_s4 + $0x8] sm:$0xff] }
 0x10e   : > { %v1761_v49 = vld [vmem:[%s3461_s4] sm:$0xff] }
 0x10f   : > { %v563_v51 = vadd.f32 %v3324_v8, %v555_v48  ;;  %v564_v1 = vmax.f32 %v562_v47, 0.0 }
 0x111   : > { %v565_v52 = vmax.f32 %v563_v51, 0.0  ;;  %v1763_v51 = vld [vmem:[%s3461_s4 + $0x10] sm:$0xff] }
 0x113   : > { %v2583_v53 = vpack.c.bf16 %v565_v52, %v564_v1 }
 0x115   : > { %2584 = vmatpush3.bf16.msra.mxu0 %v2583_v53  ;;  %v2607_v53 = vpack.c.bf16 %v1762_v50, %v1761_v49 }
 0x116   : > { %2585 = vmatprep.subr.bf16.mxu0 %v2754_v41 }
 0x117   : > { %2608 = vmatpush3.bf16.msra.mxu1 %v2607_v53 }
 0x118   : > { %2609 = vmatprep.subr.bf16.mxu1 %v2754_v41 }
 0x11d   : > { %v711_v55 = vpop.f32.mrb[8].mxu1 }
 0x11e   : > { %v662_v54 = vpop.f32.mrb[8].mxu0  ;;  %v2258_v58 = vpop.f32.mrb[9].mxu1 }
 0x11f   : > { %v663_v56 = vadd.f32 %v662_v54, %v619_v34  ;;  %v2244_v57 = vpop.f32.mrb[9].mxu0  ;;  %v714_v60 = vpop.f32.mrb[10].mxu1  ;;  %v1764_v54 = vld [vmem:[%s3461_s4 + $0x18] sm:$0xff]  ;;  %v1766_v58 = vld [vmem:[%s3461_s4 + $0x28] sm:$0xff] }
 0x120   : > { %v665_v59 = vpop.f32.mrb[10].mxu0  ;;  %v2259_v9 = vpop.f32.mrb[11].mxu1  ;;  %v1765_v57 = vld [vmem:[%s3461_s4 + $0x20] sm:$0xff] }
 0x121   : > { %v718_v61 = vadd.f32 %v711_v55, %v663_v56  ;;  %v666_v62 = vadd.f32 %v665_v59, %v622_v46  ;;  %v2245_v63 = vpop.f32.mrb[11].mxu0  ;;  %v2610_v56 = vpack.c.bf16 %v1764_v54, %v1763_v51  ;;  %v2613_v59 = vpack.c.bf16 %v1766_v58, %v1765_v57 }
 0x123   : > { %v720_v10 = vadd.f32 %v3324_v8, %v718_v61  ;;  %v719_v11 = vadd.f32 %v714_v60, %v666_v62  ;;  %2611 = vmatpush3.bf16.msra.mxu1 %v2610_v56  ;;  %v1767_v60 = vld [vmem:[%s3461_s4 + $0x30] sm:$0xff]  ;;  %v1768_v61 = vld [vmem:[%s3461_s4 + $0x38] sm:$0xff] }
 0x124   : > { %2612 = vmatprep.subr.bf16.mxu1 %v2754_v41  ;;  %v2616_v62 = vpack.c.bf16 %v1768_v61, %v1767_v60 }
 0x125   : > { %v721_v12 = vadd.f32 %v3324_v8, %v719_v11  ;;  %v722_v13 = vmax.f32 %v720_v10, 0.0  ;;  %v1769_v10 = vld [vmem:[%s3461_s4 + $0x40] sm:$0xff]  ;;  %v1770_v11 = vld [vmem:[%s3461_s4 + $0x48] sm:$0xff] }
 0x127   : > { %v723_v14 = vmax.f32 %v721_v12, 0.0  ;;  %2614 = vmatpush3.bf16.msra.mxu1 %v2613_v59 }
 0x128   : > { %2615 = vmatprep.subr.bf16.mxu1 %v2754_v41 }
 0x129   : > { %v2586_v15 = vpack.c.bf16 %v723_v14, %v722_v13 }
 0x12b   : > { %2587 = vmatpush3.bf16.msra.mxu0 %v2586_v15  ;;  %2617 = vmatpush3.bf16.msra.mxu1 %v2616_v62 }
 0x12c   : > { %2588 = vmatprep.subr.bf16.mxu0 %v2754_v41  ;;  %2618 = vmatprep.subr.bf16.mxu1 %v2754_v41 }
 0x131   : > { %v820_v18 = vpop.f32.mrb[12].mxu1 }
 0x132   : > { %v777_v17 = vpop.f32.mrb[12].mxu0  ;;  %v2286_v22 = vpop.f32.mrb[13].mxu1 }
 0x133   : > { %v821_v19 = vadd.f32 %v820_v18, %v777_v17  ;;  %v2272_v21 = vpop.f32.mrb[13].mxu0  ;;  %v823_v25 = vpop.f32.mrb[14].mxu1  ;;  %v2619_v22 = vpack.c.bf16 %v1770_v11, %v1769_v10 }
 0x134   : > { %v780_v23 = vpop.f32.mrb[14].mxu0  ;;  %v2287_v27 = vpop.f32.mrb[15].mxu1 }
 0x135   : > { %v824_v0 = vadd.f32 %v823_v25, %v780_v23  ;;  %v2273_v26 = vpop.f32.mrb[15].mxu0  ;;  %v1771_v23 = vld [vmem:[%s3461_s4 + $0x50] sm:$0xff]  ;;  %v1772_v25 = vld [vmem:[%s3461_s4 + $0x58] sm:$0xff]  ;;  %2620 = vmatpush3.bf16.msra.mxu1 %v2619_v22  ;;  %v1774_v27 = vld [vmem:[%s3461_s4 + $0x68] sm:$0xff] }
 0x136   : > { %2621 = vmatprep.subr.bf16.mxu1 %v2754_v41  ;;  %v1773_v26 = vld [vmem:[%s3461_s4 + $0x60] sm:$0xff] }
 0x145   : > { %v935_v3 = vpop.f32.mrb[16].mxu1 }
 0x146   : > { %v869_v29 = vpop.f32.mrb[16].mxu0  ;;  %v2314_v33 = vpop.f32.mrb[17].mxu1 }
 0x147   : > { %v876_v30 = vadd.f32 %v869_v29, %v821_v19  ;;  %v2300_v32 = vpop.f32.mrb[17].mxu0  ;;  %v938_v35 = vpop.f32.mrb[18].mxu1  ;;  %v2625_v29 = vpack.c.bf16 %v1774_v27, %v1773_v26 }
 0x148   : > { %v872_v5 = vpop.f32.mrb[18].mxu0  ;;  %v2315_v24 = vpop.f32.mrb[19].mxu1 }
 0x149   : > { %v878_v2 = vadd.f32 %v3324_v8, %v876_v30  ;;  %v877_v7 = vadd.f32 %v872_v5, %v824_v0  ;;  %v2301_v16 = vpop.f32.mrb[19].mxu0  ;;  %v2622_v0 = vpack.c.bf16 %v1772_v25, %v1771_v23  ;;  %v1776_v30 = vld [vmem:[%s3461_s4 + $0x78] sm:$0xff] }
 0x14b   : > { %v879_v36 = vadd.f32 %v3324_v8, %v877_v7  ;;  %v880_v4 = vmax.f32 %v878_v2, 0.0  ;;  %2623 = vmatpush3.bf16.msra.mxu1 %v2622_v0 }
 0x14c   : > { %2624 = vmatprep.subr.bf16.mxu1 %v2754_v41 }
 0x14d   : > { %v881_v37 = vmax.f32 %v879_v36, 0.0 }
 0x14f   : > { %v2589_v28 = vpack.c.bf16 %v881_v37, %v880_v4  ;;  %2626 = vmatpush3.bf16.msra.mxu1 %v2625_v29 }
 0x150   : > { %2627 = vmatprep.subr.bf16.mxu1 %v2754_v41 }
 0x151   : > { %2590 = vmatpush3.bf16.msra.mxu0 %v2589_v28 }
 0x152   : > { %2591 = vmatprep.subr.bf16.mxu0 %v2754_v41 }
 0x159   : > { %v1027_v38 = vpop.f32.mrb[20].mxu1 }
 0x15a   : > { %v978_v6 = vpop.f32.mrb[20].mxu0  ;;  %v2342_v40 = vpop.f32.mrb[21].mxu1 }
 0x15b   : > { %v979_v31 = vadd.f32 %v978_v6, %v935_v3  ;;  %v2328_v39 = vpop.f32.mrb[21].mxu0  ;;  %v1030_v34 = vpop.f32.mrb[22].mxu1  ;;  %v1775_v3 = vld [vmem:[%s3461_s4 + $0x70] sm:$0xff] }
 0x15c   : > { %v981_v20 = vpop.f32.mrb[22].mxu0  ;;  %v2343_v45 = vpop.f32.mrb[23].mxu1  ;;  %v2628_v32 = vpack.c.bf16 %v1776_v30, %v1775_v3 }
 0x15d   : > { %v1034_v43 = vadd.f32 %v1027_v38, %v979_v31  ;;  %v982_v42 = vadd.f32 %v981_v20, %v938_v35  ;;  %v2329_v44 = vpop.f32.mrb[23].mxu0 }
 0x15e   : > { %2629 = vmatpush3.bf16.msra.mxu1 %v2628_v32 }
 0x15f   : > { %v1036_v46 = vadd.f32 %v3324_v8, %v1034_v43  ;;  %v1035_v47 = vadd.f32 %v1030_v34, %v982_v42 }
 0x161   : > { %v1037_v48 = vadd.f32 %v3324_v8, %v1035_v47  ;;  %v1038_v1 = vmax.f32 %v1036_v46, 0.0 }
 0x163   : > { %v1039_v52 = vmax.f32 %v1037_v48, 0.0 }
 0x165   : > { %v2592_v55 = vpack.c.bf16 %v1039_v52, %v1038_v1 }
 0x167   : > { %2593 = vmatpush3.bf16.msra.mxu0 %v2592_v55 }
 0x168   : > { %2594 = vmatprep.subr.bf16.mxu0 %v2754_v41 }
 0x16d   : > { %v1136_v9 = vpop.f32.mrb[24].mxu1 }
 0x16e   : > { %v1093_v63 = vpop.f32.mrb[24].mxu0  ;;  %v2370_v14 = vpop.f32.mrb[25].mxu1 }
 0x16f   : > { %v1137_v12 = vadd.f32 %v1136_v9, %v1093_v63  ;;  %v2356_v13 = vpop.f32.mrb[25].mxu0  ;;  %v1139_v17 = vpop.f32.mrb[26].mxu1 }
 0x170   : > { %v1096_v15 = vpop.f32.mrb[26].mxu0  ;;  %v2371_v21 = vpop.f32.mrb[27].mxu1 }
 0x171   : > { %v1140_v18 = vadd.f32 %v1139_v17, %v1096_v15  ;;  %v2357_v19 = vpop.f32.mrb[27].mxu0 }
 0x181   : > { %v1251_v5 = vpop.f32.mrb[28].mxu1 }
 0x182   : > { %v1185_v33 = vpop.f32.mrb[28].mxu0  ;;  %v2398_v7 = vpop.f32.mrb[29].mxu1 }
 0x183   : > { %v1192_v35 = vadd.f32 %v1185_v33, %v1137_v12  ;;  %v2384_v2 = vpop.f32.mrb[29].mxu0  ;;  %v1254_v24 = vpop.f32.mrb[30].mxu1 }
 0x184   : > { %v1188_v16 = vpop.f32.mrb[30].mxu0  ;;  %v2399_v28 = vpop.f32.mrb[31].mxu1 }
 0x185   : > { %v1194_v36 = vadd.f32 %v3324_v8, %v1192_v35  ;;  %v1193_v4 = vadd.f32 %v1188_v16, %v1140_v18  ;;  %v2385_v37 = vpop.f32.mrb[31].mxu0 }
 0x187   : > { %v1195_v6 = vadd.f32 %v3324_v8, %v1193_v4  ;;  %v1196_v38 = vmax.f32 %v1194_v36, 0.0 }
 0x189   : > { %v1197_v31 = vmax.f32 %v1195_v6, 0.0  ;;  %v1674_v6 = vld [vmem:[%s3460_s3] sm:$0xff] }
 0x18b   : > { %v2595_v39 = vpack.c.bf16 %v1197_v31, %v1196_v38 }
 0x18d   : > { %2596 = vmatpush3.bf16.msra.mxu0 %v2595_v39  ;;  %v1993_v39 = vld [vmem:[%s3462_s5] ss:$0 sm:$0xff] }
 0x18e   : > { %2597 = vmatprep.subr.bf16.mxu0 %v2754_v41 }
 0x195   : > { %v1343_v20 = vpop.f32.mrb[32].mxu1 }
 0x196   : > { %v1294_v40 = vpop.f32.mrb[32].mxu0  ;;  %v2426_v42 = vpop.f32.mrb[33].mxu1 }
 0x197   : > { %v1295_v34 = vadd.f32 %v1294_v40, %v1251_v5  ;;  %v2412_v43 = vpop.f32.mrb[33].mxu0  ;;  %v1346_v45 = vpop.f32.mrb[34].mxu1 }
 0x198   : > { %v1297_v44 = vpop.f32.mrb[34].mxu0  ;;  %v2427_v49 = vpop.f32.mrb[35].mxu1 }
 0x199   : > { %v1350_v46 = vadd.f32 %v1343_v20, %v1295_v34  ;;  %v1298_v47 = vadd.f32 %v1297_v44, %v1254_v24  ;;  %v2413_v48 = vpop.f32.mrb[35].mxu0 }
 0x19b   : > { %v1352_v50 = vadd.f32 %v3324_v8, %v1350_v46  ;;  %v1351_v51 = vadd.f32 %v1346_v45, %v1298_v47 }
 0x19d   : > { %v1353_v1 = vadd.f32 %v3324_v8, %v1351_v51  ;;  %v1354_v52 = vmax.f32 %v1352_v50, 0.0 }
 0x19f   : > { %v1355_v53 = vmax.f32 %v1353_v1, 0.0 }
 0x1a1   : > { %v2598_v54 = vpack.c.bf16 %v1355_v53, %v1354_v52 }
 0x1a3   : > { %2599 = vmatpush3.bf16.msra.mxu0 %v2598_v54 }
 0x1a4   : > { %2600 = vmatprep.subr.bf16.mxu0 %v2754_v41 }
 0x1a9   : > { %v1452_v56 = vpop.f32.mrb[36].mxu1 }
 0x1aa   : > { %v1409_v55 = vpop.f32.mrb[36].mxu0  ;;  %v2454_v59 = vpop.f32.mrb[37].mxu1 }
 0x1ab   : > { %v1453_v57 = vadd.f32 %v1452_v56, %v1409_v55  ;;  %v2440_v58 = vpop.f32.mrb[37].mxu0  ;;  %v1455_v61 = vpop.f32.mrb[38].mxu1 }
 0x1ac   : > { %v1412_v60 = vpop.f32.mrb[38].mxu0  ;;  %v2455_v9 = vpop.f32.mrb[39].mxu1 }
 0x1ad   : > { %v1456_v62 = vadd.f32 %v1455_v61, %v1412_v60  ;;  %v2441_v63 = vpop.f32.mrb[39].mxu0 }
 0x1bd   : > { %v1567_v11 = vpop.f32.mrb[40].mxu1 }
 0x1be   : > { %v1501_v10 = vpop.f32.mrb[40].mxu0  ;;  %v2482_v14 = vpop.f32.mrb[41].mxu1 }
 0x1bf   : > { %v1508_v12 = vadd.f32 %v1501_v10, %v1453_v57  ;;  %v2468_v13 = vpop.f32.mrb[41].mxu0  ;;  %v1570_v17 = vpop.f32.mrb[42].mxu1 }
 0x1c0   : > { %v1504_v15 = vpop.f32.mrb[42].mxu0  ;;  %v2483_v22 = vpop.f32.mrb[43].mxu1 }
 0x1c1   : > { %v1510_v18 = vadd.f32 %v3324_v8, %v1508_v12  ;;  %v1509_v19 = vadd.f32 %v1504_v15, %v1456_v62  ;;  %v2469_v21 = vpop.f32.mrb[43].mxu0 }
 0x1c3   : > { %v1511_v23 = vadd.f32 %v3324_v8, %v1509_v19  ;;  %v1512_v25 = vmax.f32 %v1510_v18, 0.0 }
 0x1c5   : > { %v1513_v0 = vmax.f32 %v1511_v23, 0.0 }
 0x1c7   : > { %v2601_v26 = vpack.c.bf16 %v1513_v0, %v1512_v25 }
 0x1c9   : > { %2602 = vmatpush3.bf16.msra.mxu0 %v2601_v26 }
 0x1ca   : > { %2603 = vmatprep.subr.bf16.mxu0 %v2754_v41 }
 0x1d1   : > { %v1659_v29 = vpop.f32.mrb[44].mxu1 }
 0x1d2   : > { %v1610_v27 = vpop.f32.mrb[44].mxu0  ;;  %v2510_v32 = vpop.f32.mrb[45].mxu1 }
 0x1d3   : > { %v1611_v3 = vadd.f32 %v1610_v27, %v1567_v11  ;;  %v2496_v30 = vpop.f32.mrb[45].mxu0  ;;  %v1662_v5 = vpop.f32.mrb[46].mxu1 }
 0x1d4   : > { %v1613_v33 = vpop.f32.mrb[46].mxu0  ;;  %v2511_v16 = vpop.f32.mrb[47].mxu1 }
 0x1d5   : > { %v1666_v35 = vadd.f32 %v1659_v29, %v1611_v3  ;;  %v1614_v2 = vadd.f32 %v1613_v33, %v1570_v17  ;;  %v2497_v7 = vpop.f32.mrb[47].mxu0 }
 0x1d7   : > { %v1668_v24 = vadd.f32 %v3324_v8, %v1666_v35  ;;  %v1667_v36 = vadd.f32 %v1662_v5, %v1614_v2 }
 0x1d9   : > { %v1669_v4 = vadd.f32 %v3324_v8, %v1667_v36  ;;  %v1670_v37 = vmax.f32 %v1668_v24, 0.0 }
 0x1db   : > { %v1671_v41 = vmax.f32 %v1669_v4, 0.0 }
 0x1dd   : > { %v2604_v28 = vpack.c.bf16 %v1671_v41, %v1670_v37 }
 0x1df   : > { %2605 = vmatpush3.bf16.msra.mxu0 %v2604_v28 }
 0x1e2   : > { %2545 = vmatmul.mubr.f32.vlgmr.msra.gmra.mrb[48].mxu0 %v1674_v6 }
 0x2b5   : > { %v1757_v38 = vpop.f32.mrb[48].mxu0 }
 0x2b6   : > { %v2546_v31 = vpop.f32.mrb[49].mxu0  ;;  %2580 = vmatmul.mubr.f32.vlgmr.msra.gmra.mrb[48].mxu1 %v1757_v38 }
 0x389   : > { %v1850_v8 = vpop.f32.mrb[48].mxu1 }
 0x38a   : > { %v1851_v40 = vadd.f32 %v1993_v39, %v1850_v8  ;;  %v2581_v20 = vpop.f32.mrb[49].mxu1 }
 0x38c   : > { %1854 = vst [vmem:[%s247_s10] sm:$0xff] %v1851_v40 }
 0x38d   : > { %2701 = shalt.err (!%p2698_p3)
}
 0x38e   : > { %s2702_s17 = scalar_lea.hbm %s3415_s14, 128  ;;  %s2706_s28 = scalar_lea.hbm %s3463_s6, 256 }
 0x38f   : > { %p2703_p4 = scmp.ne.s32.totalorder %s3415_s14, %s2702_s17  ;;  %p2707_p9 = scmp.lt.u32.totalorder %s3415_s14, %s3463_s6 }
 0x390   : > { %p2708_p10 = scmp.lt.u32.totalorder %s2706_s28, %s2702_s17  ;;  %p2710_p12 = scmp.lt.u32.totalorder %s2702_s17, %s3415_s14 }
 0x391   : > { %p2704_p7 = pnand %p2703_p4, %p2829_p5 }
 0x392   : > { %p2709_p11 = por %p2708_p10, %p2707_p9 }
 0x393   : > { %p2705_p8 = pneg %p2704_p7 }
 0x394   : > { %p2711_p13 = por %p2710_p12, %p2709_p11 }
 0x396   : > { %p2712_p0 = pnand %p2711_p13, %p2705_p8 }
 0x398   : > { %2715 = shalt.err (!%p2712_p0)
}
 0x399   : > { %2631 = dma.vmem_to_hbm [thread:$0]  (%p2829_p5), %s3417_s11, 128, %s3415_s14, %s1856_s15  }
 0x39a PF: > { %p2637_p1 = scmp.ge.s32.totalorder %s2750_s24, 2  ;;  %s1881_s10 = sand.u32 1, %s2738_s21  }
 0x39b   : > { %s1882_s12 = scalar_lea.sflag [#allocation4], %s1881_s10 }
 0x39c   : > { %p2634_p2 = pnand %p2637_p1, %p2833_p6 }
 0x39e   : > { %2733 = dma.done.wait (!%p2634_p2), %s1882_s12, 128  }
 0x39f   : > { %2735 = vsyncadd (!%p2634_p2), %s1882_s12, 4294967168  ;;  %p16_p3 = scmp.ge.s32.totalorder %s2816_s27, 4   ;;  %s3466_s21 = smov %s2742_s22 }
 0x3a0   : > { %s3467_s22 = smov %s2746_s23  ;;  %s3468_s23 = smov %s2827_s30 }
 0x3a1   : > { %s3469_s24 = smov %s2816_s27  ;;  %18 = sbr.rel (!%p16_p3) target bundleno = 3 (0x3), region = 81 }
 0x3a8   :  { %1887 = vsyncpa [#allocation4], 1 }
 0x3a9   :  { %1889 = vsyncpa [#allocation4 + $0x1], 1 }

</bundles_post_ra>
